<compile_context>
chip_gen: v7x
topology: tpu7x:2x2x1
jax: 0.10.0
libtpu: 0.0.40
codegen_flags: <defaults>
</compile_context>

<pallas_src>
import functools

import jax
import jax.numpy as jnp
from jax.experimental import pallas as pl
from jax.experimental.pallas import tpu as pltpu

EPS = 1e-5  # nn.BatchNorm2d default eps


def _round_up(x, m):
    return ((x + m - 1) // m) * m


def _auto_tile_m(m, cin, k4, requested, vmem_budget=20 * 1024 * 1024):
    """Row-tile size that keeps the double-buffered working set within budget."""
    resident = 2 * cin * k4 * 4 + 4 * k4 * 4          # weights + scale/shift buffers
    budget = max(vmem_budget - resident, 1 << 20)
    bytes_per_row = 8 * (cin + k4)                    # 2 buffers * (x + out) rows, f32
    cap = max(8, (budget // bytes_per_row) // 8 * 8)
    t = min(requested, cap, _round_up(m, 8))
    return max(8, (t // 8) * 8)


def _make_stats_kernel(cin):
    """Per-tile colsum(X) and Gram-matrix X^T X partials (for analytic BN stats)."""

    def kernel(x_ref, psum_ref, pgram_ref):
        x = x_ref[...].astype(jnp.float32)
        psum_ref[...] = jnp.sum(x, axis=0, keepdims=True)[None]
        # Cin is small: build X^T X with Cin broadcast sweeps (VPU + XLU reduce),
        # avoiding a transposed in-kernel matmul.
        # TODO(synk): for large Cin (>~32) switch to a dot_general contracting dim 0.
        rows = [jnp.sum(x * x[:, ci:ci + 1], axis=0, keepdims=True)
                for ci in range(cin)]
        pgram_ref[...] = jnp.concatenate(rows, axis=0)[None]

    return kernel


def _make_fused_kernel(cin, use_mxu):
    """ConvTranspose-as-matmul + folded BatchNorm affine + SiLU on one row tile."""

    def kernel(x_ref, w_ref, sc_ref, sh_ref, o_ref):
        if use_mxu:
            acc = jnp.dot(x_ref[...], w_ref[...],
                          preferred_element_type=jnp.float32)
        else:
            # Contraction dim far below MXU width -> a few VPU broadcast-MACs.
            x = x_ref[...].astype(jnp.float32)
            w = w_ref[...].astype(jnp.float32)
            acc = x[:, 0:1] * w[0:1, :]
            for ci in range(1, cin):                  # static unroll, cin small
                acc = acc + x[:, ci:ci + 1] * w[ci:ci + 1, :]
        z = acc * sc_ref[...] + sh_ref[...]
        o_ref[...] = (z * jax.nn.sigmoid(z)).astype(o_ref.dtype)

    return kernel


def upsample_block(x_nchw, w, bias, gamma, beta, *, tile_m=1024, data_format="NCHW"):
    """Forward of UpsampleBlock.

    x_nchw: (N, Cin, H, W); w: (Cin, Cout, 2, 2) (PyTorch ConvTranspose2d layout);
    bias/gamma/beta: (Cout,).  Returns NCHW (default) or NHWC.
    """
    N, Cin, H, W = x_nchw.shape
    Cout = w.shape[1]
    M = N * H * W
    K4 = 4 * Cout

    tile_m = _auto_tile_m(M, Cin, K4, requested=tile_m)
    Mp = _round_up(M, tile_m)
    Mt = Mp // tile_m

    f32 = jnp.float32
    cdt = x_nchw.dtype  # operand / output storage dtype (f32 here; bf16 supported)

    # --- glue: NCHW -> (M, Cin) rows (n,i,j); weight -> (Cin, K4) cols (ki,kj,co).
    x2d = jnp.transpose(x_nchw, (0, 2, 3, 1)).reshape(M, Cin)
    if Mp > M:
        # Zero rows: contribute nothing to colsum / Gram, so no masking needed.
        x2d = jnp.pad(x2d, ((0, Mp - M), (0, 0)))
    w2d = jnp.transpose(w, (0, 2, 3, 1)).reshape(Cin, K4).astype(cdt)
    # ConvTranspose bias dropped: a per-channel constant immediately before
    # train-mode BatchNorm cancels exactly.
    del bias

    cparams = pltpu.CompilerParams(
        dimension_semantics=("parallel",),          # shards M across v7x's 2 TCs
        vmem_limit_bytes=48 * 1024 * 1024,          # <= 64 MiB/TC on v7x, fine v5e/v6e
    )

    # --- Pallas pass 1 (stats only): per-tile colsum(X) and X^T X partials.
    psum, pgram = pl.pallas_call(
        _make_stats_kernel(Cin),
        out_shape=(
            jax.ShapeDtypeStruct((Mt, 1, Cin), f32),
            jax.ShapeDtypeStruct((Mt, Cin, Cin), f32),
        ),
        grid=(Mt,),
        in_specs=[pl.BlockSpec((tile_m, Cin), lambda i: (i, 0))],
        out_specs=(
            pl.BlockSpec((1, 1, Cin), lambda i: (i, 0, 0)),
            pl.BlockSpec((1, Cin, Cin), lambda i: (i, 0, 0)),
        ),
        compiler_params=cparams,
    )(x2d)

    # --- tiny jnp combine: analytic global batch statistics, folded BN affine.
    colsum = jnp.sum(psum, axis=0).reshape(Cin).astype(f32)       # (Cin,)
    gram = jnp.sum(pgram, axis=0).astype(f32)                     # (Cin, Cin)
    w32 = w2d.astype(f32)
    s_col = colsum @ w32                                          # sum_m y[m, c]
    ss_col = jnp.sum(w32 * (gram @ w32), axis=0)                  # sum_m y[m, c]^2
    count = jnp.float32(4 * M)
    s_ch = s_col.reshape(4, Cout).sum(axis=0)                     # pool 4 positions
    ss_ch = ss_col.reshape(4, Cout).sum(axis=0)
    mean = s_ch / count
    var = jnp.maximum(ss_ch / count - mean * mean, 0.0)           # clamp cancellation
    scale_ch = gamma.astype(f32) * jax.lax.rsqrt(var + EPS)
    shift_ch = beta.astype(f32) - mean * scale_ch
    scale_cols = jnp.tile(scale_ch, 4).reshape(1, K4)
    shift_cols = jnp.tile(shift_ch, 4).reshape(1, K4)

    # --- Pallas pass 2: fused matmul + BN affine + SiLU; single output write.
    use_mxu = Cin >= 8
    out2d = pl.pallas_call(
        _make_fused_kernel(Cin, use_mxu),
        out_shape=jax.ShapeDtypeStruct((Mp, K4), cdt),
        grid=(Mt,),
        in_specs=[
            pl.BlockSpec((tile_m, Cin), lambda i: (i, 0)),
            pl.BlockSpec((Cin, K4), lambda i: (0, 0)),      # resident weights
            pl.BlockSpec((1, K4), lambda i: (0, 0)),        # resident BN scale
            pl.BlockSpec((1, K4), lambda i: (0, 0)),        # resident BN shift
        ],
        out_specs=pl.BlockSpec((tile_m, K4), lambda i: (i, 0)),
        compiler_params=cparams,
    )(x2d, w2d, scale_cols, shift_cols)

    # --- glue: scatter the 4 kernel positions into the 2x grid (one XLA copy).
    y = out2d[:M].reshape(N, H, W, 2, 2, Cout)
    y = y.transpose(0, 1, 3, 2, 4, 5).reshape(N, 2 * H, 2 * W, Cout)
    if data_format == "NHWC":
        return y
    return jnp.transpose(y, (0, 3, 1, 2))


def _reference(x, w, bias, gamma, beta):
    """Pure-jnp reference of the PyTorch forward (training-mode BN)."""
    N, Cin, H, W = x.shape
    Cout = w.shape[1]
    t = jnp.einsum("ncij,cokl->noikjl", x, w,
                   precision=jax.lax.Precision.HIGHEST)
    y = t.reshape(N, Cout, 2 * H, 2 * W) + bias[None, :, None, None]
    mean = jnp.mean(y, axis=(0, 2, 3), keepdims=True)
    var = jnp.mean((y - mean) ** 2, axis=(0, 2, 3), keepdims=True)
    z = (y - mean) * jax.lax.rsqrt(var + EPS)
    z = z * gamma[None, :, None, None] + beta[None, :, None, None]
    return z * jax.nn.sigmoid(z)


def _run_case(key, N, Cin, Cout, H, W, tile_m, data_format="NCHW", tol=1e-3):
    k_x, k_w, k_b, k_g, k_be = jax.random.split(key, 5)
    x = jax.random.normal(k_x, (N, Cin, H, W), dtype=jnp.float32)
    # PyTorch ConvTranspose2d weight layout: (in_channels, out_channels, kH, kW)
    w = 0.1 * jax.random.normal(k_w, (Cin, Cout, 2, 2), dtype=jnp.float32)
    bias = 0.1 * jax.random.normal(k_b, (Cout,), dtype=jnp.float32)
    gamma = 1.0 + 0.1 * jax.random.normal(k_g, (Cout,), dtype=jnp.float32)
    beta = 0.1 * jax.random.normal(k_be, (Cout,), dtype=jnp.float32)

    fn = jax.jit(functools.partial(upsample_block, tile_m=tile_m,
                                   data_format=data_format))
    out = jax.block_until_ready(fn(x, w, bias, gamma, beta))
    ref = _reference(x, w, bias, gamma, beta)
    if data_format == "NHWC":
        ref = jnp.transpose(ref, (0, 2, 3, 1))
        assert out.shape == (N, 2 * H, 2 * W, Cout), out.shape
    else:
        assert out.shape == (N, Cout, 2 * H, 2 * W), out.shape
    err = jnp.max(jnp.abs(out - ref))
    assert jnp.allclose(out, ref, atol=tol, rtol=tol), f"mismatch, max err {err}"


if __name__ == "__main__":
    key = jax.random.PRNGKey(0)
    k1, k2, k3 = jax.random.split(key, 3)

    # Case 1: canonical small shapes, VPU contraction path, 4-step grid.
    _run_case(k1, N=2, Cin=4, Cout=8, H=16, W=16, tile_m=128, tol=1e-3)

    # Case 2: ragged M + odd channel counts (row padding, narrow lane width).
    _run_case(k2, N=1, Cin=3, Cout=5, H=13, W=13, tile_m=64, tol=1e-3)

    # Case 3: MXU path (Cin >= 8), lane-dense columns, NHWC fast-path output.
    # Looser tolerance: the in-kernel f32 MXU matmul may use reduced-precision passes.
    _run_case(k3, N=2, Cin=16, Cout=32, H=8, W=8, tile_m=64,
              data_format="NHWC", tol=2e-2)

    print("KERNEL_OK")
</pallas_src>

<mosaic_0001>
module attributes {stable_mosaic.version = 11 : i64} {
  func.func @kernel(%arg0: i32, %arg1: memref<128x4xf32, #tpu.memory_space<vmem>>, %arg2: memref<1x1x4xf32, #tpu.memory_space<vmem>>, %arg3: memref<1x4x4xf32, #tpu.memory_space<vmem>>) attributes {dimension_semantics = [#tpu.dimension_semantics<parallel>], iteration_bounds = array<i64: 4>, scalar_prefetch = 0 : i64, scratch_operands = 0 : i64, tpu.core_type = #tpu.core_type<tc>, window_params = [{transform_indices = @transform_0, window_bounds = array<i64: 128, 4>}, {transform_indices = @transform_1, window_bounds = array<i64: 1, 1, 4>}, {transform_indices = @transform_2, window_bounds = array<i64: 1, 4, 4>}]} {
    %c0 = arith.constant 0 : index
    %c0_0 = arith.constant 0 : index
    %0 = vector.load %arg1[%c0, %c0_0] : memref<128x4xf32, #tpu.memory_space<vmem>>, vector<128x4xf32>
    %cst = arith.constant dense<0.000000e+00> : vector<4xf32>
    %1 = vector.multi_reduction <add>, %0, %cst [0] : vector<128x4xf32> to vector<4xf32>
    %2 = vector.shape_cast %1 : vector<4xf32> to vector<1x4xf32>
    %3 = vector.shape_cast %2 : vector<1x4xf32> to vector<1x1x4xf32>
    %c0_1 = arith.constant 0 : index
    %c0_2 = arith.constant 0 : index
    %c0_3 = arith.constant 0 : index
    %4 = vector.load %arg2[%c0_1, %c0_2, %c0_3] : memref<1x1x4xf32, #tpu.memory_space<vmem>>, vector<1x1x4xf32>
    tpu.vector_store %arg2[%c0_1, %c0_2, %c0_3], %3 {strides = array<i32>} : memref<1x1x4xf32, #tpu.memory_space<vmem>>, vector<1x1x4xf32>,
    %5 = vector.extract_strided_slice %0 {offsets = [0, 0], sizes = [128, 1], strides = [1, 1]} : vector<128x4xf32> to vector<128x1xf32>
    %6 = vector.broadcast %5 : vector<128x1xf32> to vector<128x4xf32>
    %7 = arith.mulf %0, %6 : vector<128x4xf32>
    %cst_4 = arith.constant dense<0.000000e+00> : vector<4xf32>
    %8 = vector.multi_reduction <add>, %7, %cst_4 [0] : vector<128x4xf32> to vector<4xf32>
    %9 = vector.shape_cast %8 : vector<4xf32> to vector<1x4xf32>
    %10 = vector.extract_strided_slice %0 {offsets = [0, 1], sizes = [128, 1], strides = [1, 1]} : vector<128x4xf32> to vector<128x1xf32>
    %11 = vector.broadcast %10 : vector<128x1xf32> to vector<128x4xf32>
    %12 = arith.mulf %0, %11 : vector<128x4xf32>
    %cst_5 = arith.constant dense<0.000000e+00> : vector<4xf32>
    %13 = vector.multi_reduction <add>, %12, %cst_5 [0] : vector<128x4xf32> to vector<4xf32>
    %14 = vector.shape_cast %13 : vector<4xf32> to vector<1x4xf32>
    %15 = vector.extract_strided_slice %0 {offsets = [0, 2], sizes = [128, 1], strides = [1, 1]} : vector<128x4xf32> to vector<128x1xf32>
    %16 = vector.broadcast %15 : vector<128x1xf32> to vector<128x4xf32>
    %17 = arith.mulf %0, %16 : vector<128x4xf32>
    %cst_6 = arith.constant dense<0.000000e+00> : vector<4xf32>
    %18 = vector.multi_reduction <add>, %17, %cst_6 [0] : vector<128x4xf32> to vector<4xf32>
    %19 = vector.shape_cast %18 : vector<4xf32> to vector<1x4xf32>
    %20 = vector.extract_strided_slice %0 {offsets = [0, 3], sizes = [128, 1], strides = [1, 1]} : vector<128x4xf32> to vector<128x1xf32>
    %21 = vector.broadcast %20 : vector<128x1xf32> to vector<128x4xf32>
    %22 = arith.mulf %0, %21 : vector<128x4xf32>
    %cst_7 = arith.constant dense<0.000000e+00> : vector<4xf32>
    %23 = vector.multi_reduction <add>, %22, %cst_7 [0] : vector<128x4xf32> to vector<4xf32>
    %24 = vector.shape_cast %23 : vector<4xf32> to vector<1x4xf32>
    %25 = tpu.concatenate %9, %14, %19, %24 in 0 : vector<1x4xf32>, vector<1x4xf32>, vector<1x4xf32>, vector<1x4xf32> -> vector<4x4xf32>
    %26 = vector.shape_cast %25 : vector<4x4xf32> to vector<1x4x4xf32>
    %c0_8 = arith.constant 0 : index
    %c0_9 = arith.constant 0 : index
    %c0_10 = arith.constant 0 : index
    %27 = vector.load %arg3[%c0_8, %c0_9, %c0_10] : memref<1x4x4xf32, #tpu.memory_space<vmem>>, vector<1x4x4xf32>
    tpu.vector_store %arg3[%c0_8, %c0_9, %c0_10], %26 {strides = array<i32>} : memref<1x4x4xf32, #tpu.memory_space<vmem>>, vector<1x4x4xf32>,
    return
  }
  func.func @transform_0(%arg0: i32) -> (i32, i32) {
    %c0_i32 = arith.constant 0 : i32
    %c0_i32_0 = arith.constant 0 : i32
    return %arg0, %c0_i32 : i32, i32
  }
  func.func @transform_1(%arg0: i32) -> (i32, i32, i32) {
    %c0_i32 = arith.constant 0 : i32
    %c0_i32_0 = arith.constant 0 : i32
    %c0_i32_1 = arith.constant 0 : i32
    return %arg0, %c0_i32, %c0_i32_0 : i32, i32, i32
  }
  func.func @transform_2(%arg0: i32) -> (i32, i32, i32) {
    %c0_i32 = arith.constant 0 : i32
    %c0_i32_0 = arith.constant 0 : i32
    %c0_i32_1 = arith.constant 0 : i32
    return %arg0, %c0_i32, %c0_i32_0 : i32, i32, i32
  }
}

module attributes {stable_mosaic.version = 11 : i64} {
  func.func @kernel(%arg0: i32, %arg1: memref<128x4xf32, #tpu.memory_space<vmem>>, %arg2: memref<4x32xf32, #tpu.memory_space<vmem>>, %arg3: memref<1x32xf32, #tpu.memory_space<vmem>>, %arg4: memref<1x32xf32, #tpu.memory_space<vmem>>, %arg5: memref<128x32xf32, #tpu.memory_space<vmem>>) attributes {dimension_semantics = [#tpu.dimension_semantics<parallel>], iteration_bounds = array<i64: 4>, scalar_prefetch = 0 : i64, scratch_operands = 0 : i64, tpu.core_type = #tpu.core_type<tc>, window_params = [{transform_indices = @transform_0, window_bounds = array<i64: 128, 4>}, {pipeline_mode = #tpu.pipeline_mode<synchronous>, transform_indices = @transform_1, window_bounds = array<i64: 4, 32>}, {pipeline_mode = #tpu.pipeline_mode<synchronous>, transform_indices = @transform_2, window_bounds = array<i64: 1, 32>}, {pipeline_mode = #tpu.pipeline_mode<synchronous>, transform_indices = @transform_3, window_bounds = array<i64: 1, 32>}, {transform_indices = @transform_4, window_bounds = array<i64: 128, 32>}]} {
    %c0 = arith.constant 0 : index
    %c0_0 = arith.constant 0 : index
    %0 = vector.load %arg1[%c0, %c0_0] : memref<128x4xf32, #tpu.memory_space<vmem>>, vector<128x4xf32>
    %c0_1 = arith.constant 0 : index
    %c0_2 = arith.constant 0 : index
    %1 = vector.load %arg2[%c0_1, %c0_2] : memref<4x32xf32, #tpu.memory_space<vmem>>, vector<4x32xf32>
    %2 = vector.extract_strided_slice %0 {offsets = [0, 0], sizes = [128, 1], strides = [1, 1]} : vector<128x4xf32> to vector<128x1xf32>
    %3 = vector.extract_strided_slice %1 {offsets = [0, 0], sizes = [1, 32], strides = [1, 1]} : vector<4x32xf32> to vector<1x32xf32>
    %4 = vector.broadcast %2 : vector<128x1xf32> to vector<128x32xf32>
    %5 = vector.broadcast %3 : vector<1x32xf32> to vector<128x32xf32>
    %6 = arith.mulf %4, %5 : vector<128x32xf32>
    %7 = vector.extract_strided_slice %0 {offsets = [0, 1], sizes = [128, 1], strides = [1, 1]} : vector<128x4xf32> to vector<128x1xf32>
    %8 = vector.extract_strided_slice %1 {offsets = [1, 0], sizes = [1, 32], strides = [1, 1]} : vector<4x32xf32> to vector<1x32xf32>
    %9 = vector.broadcast %7 : vector<128x1xf32> to vector<128x32xf32>
    %10 = vector.broadcast %8 : vector<1x32xf32> to vector<128x32xf32>
    %11 = arith.mulf %9, %10 : vector<128x32xf32>
    %12 = arith.addf %6, %11 : vector<128x32xf32>
    %13 = vector.extract_strided_slice %0 {offsets = [0, 2], sizes = [128, 1], strides = [1, 1]} : vector<128x4xf32> to vector<128x1xf32>
    %14 = vector.extract_strided_slice %1 {offsets = [2, 0], sizes = [1, 32], strides = [1, 1]} : vector<4x32xf32> to vector<1x32xf32>
    %15 = vector.broadcast %13 : vector<128x1xf32> to vector<128x32xf32>
    %16 = vector.broadcast %14 : vector<1x32xf32> to vector<128x32xf32>
    %17 = arith.mulf %15, %16 : vector<128x32xf32>
    %18 = arith.addf %12, %17 : vector<128x32xf32>
    %19 = vector.extract_strided_slice %0 {offsets = [0, 3], sizes = [128, 1], strides = [1, 1]} : vector<128x4xf32> to vector<128x1xf32>
    %20 = vector.extract_strided_slice %1 {offsets = [3, 0], sizes = [1, 32], strides = [1, 1]} : vector<4x32xf32> to vector<1x32xf32>
    %21 = vector.broadcast %19 : vector<128x1xf32> to vector<128x32xf32>
    %22 = vector.broadcast %20 : vector<1x32xf32> to vector<128x32xf32>
    %23 = arith.mulf %21, %22 : vector<128x32xf32>
    %24 = arith.addf %18, %23 : vector<128x32xf32>
    %c0_3 = arith.constant 0 : index
    %c0_4 = arith.constant 0 : index
    %25 = vector.load %arg3[%c0_3, %c0_4] : memref<1x32xf32, #tpu.memory_space<vmem>>, vector<1x32xf32>
    %26 = vector.broadcast %25 : vector<1x32xf32> to vector<128x32xf32>
    %27 = arith.mulf %24, %26 : vector<128x32xf32>
    %c0_5 = arith.constant 0 : index
    %c0_6 = arith.constant 0 : index
    %28 = vector.load %arg4[%c0_5, %c0_6] : memref<1x32xf32, #tpu.memory_space<vmem>>, vector<1x32xf32>
    %29 = vector.broadcast %28 : vector<1x32xf32> to vector<128x32xf32>
    %30 = arith.addf %27, %29 : vector<128x32xf32>
    %31 = arith.negf %30 : vector<128x32xf32>
    %32 = math.exp %31 : vector<128x32xf32>
    %cst = arith.constant 1.000000e+00 : f32
    %33 = vector.broadcast %cst : f32 to vector<128x32xf32>
    %34 = arith.addf %33, %32 : vector<128x32xf32>
    %35 = arith.divf %33, %34 : vector<128x32xf32>
    %36 = arith.mulf %30, %35 : vector<128x32xf32>
    %c0_7 = arith.constant 0 : index
    %c0_8 = arith.constant 0 : index
    %37 = vector.load %arg5[%c0_7, %c0_8] : memref<128x32xf32, #tpu.memory_space<vmem>>, vector<128x32xf32>
    tpu.vector_store %arg5[%c0_7, %c0_8], %36 {strides = array<i32>} : memref<128x32xf32, #tpu.memory_space<vmem>>, vector<128x32xf32>,
    return
  }
  func.func @transform_0(%arg0: i32) -> (i32, i32) {
    %c0_i32 = arith.constant 0 : i32
    %c0_i32_0 = arith.constant 0 : i32
    return %arg0, %c0_i32 : i32, i32
  }
  func.func @transform_1(%arg0: i32) -> (i32, i32) {
    %c0_i32 = arith.constant 0 : i32
    %c0_i32_0 = arith.constant 0 : i32
    %c0_i32_1 = arith.constant 0 : i32
    return %c0_i32, %c0_i32_0 : i32, i32
  }
  func.func @transform_2(%arg0: i32) -> (i32, i32) {
    %c0_i32 = arith.constant 0 : i32
    %c0_i32_0 = arith.constant 0 : i32
    %c0_i32_1 = arith.constant 0 : i32
    return %c0_i32, %c0_i32_0 : i32, i32
  }
  func.func @transform_3(%arg0: i32) -> (i32, i32) {
    %c0_i32 = arith.constant 0 : i32
    %c0_i32_0 = arith.constant 0 : i32
    %c0_i32_1 = arith.constant 0 : i32
    return %c0_i32, %c0_i32_0 : i32, i32
  }
  func.func @transform_4(%arg0: i32) -> (i32, i32) {
    %c0_i32 = arith.constant 0 : i32
    %c0_i32_0 = arith.constant 0 : i32
    return %arg0, %c0_i32 : i32, i32
  }
}

</mosaic_0001>

<bundles_post_ra>
// kernel: tile.18
= control target key start
LH: loop header
LB: loop body
LE: loop exit
PB: predicated region body
PF: predicated region fallthrough
CT: control target
= control target key end

     0   :  { %s22_s0 = inlined_call_operand.vmem [shape: f32[8], index: 0, kind: input, shape index: {}]   ;;  %s23_s1 = inlined_call_operand.vmem [shape: f32[4,8], index: 1, kind: output, shape index: {}]  }
   0x1   :  { %v4_v0 = vld [vmem:[%s22_s0] ss:$0 sm:$0xff] }
   0x2   :  { %5 = vst [vmem:[%s23_s1] sm:$0xf] %v4_v0 }

// kernel: tile.19
= control target key start
LH: loop header
LB: loop body
LE: loop exit
PB: predicated region body
PF: predicated region fallthrough
CT: control target
= control target key end

     0   :  { %vm7_vm0 = vcmask 64512   ;;  %s37_s8 = smov 8   ;;  %s38_s9 = smov 16   ;;  %vm13_vm1 = vcmask 261312   ;;  %vm19_vm2 = vcmask 195712   ;;  %vm25_vm3 = vcmask 130112   ;;  %s55_s0 = inlined_call_operand.vmem [shape: f32[4,8], index: 0, kind: input, shape index: {}]   ;;  %s56_s1 = inlined_call_operand.vmem [shape: f32[1,32], index: 1, kind: output, shape index: {}]  }
   0x1   :  { %v4_v0 = vld [vmem:[%s55_s0] sm:$0xf]  ;;  %s36_s0 = smov 24  }
   0x2   :  { %5 = vst [vmem:[#allocation1] sm:$0xf] %v4_v0 }
   0x9   :  { %v10_v1 = vld [vmem:[#allocation1 + $0x3] sm:$0x1]   ;;  %v22_v2 = vld [vmem:[#allocation1 + $0x1] sm:$0x1]   ;;  %v6_v3 = vld [vmem:[#allocation1] sm:$0x1]  }
   0xa   :  { %11 = vrot.lane.b32.xlu0 %v10_v1, %s36_s0  ;;  %23 = vrot.lane.b32.xlu1 %v22_v2, %s37_s8  ;;  %v16_v4 = vld [vmem:[#allocation1 + $0x2] sm:$0x1]   ;;  %8 = vst.msk [vmem:[#allocation0] sm:$0x1] %vm7_vm0, %v6_v3  }
   0xe   :  { %17 = vrot.lane.b32.xlu0 %v16_v4, %s38_s9 }
  0x7c   :  { %v12_v5 = vpop.permute.xlu0 %11   ;;  %v24_v6 = vpop.permute.xlu1 %23  }
  0x7d   :  { %14 = vst.msk [vmem:[#allocation0] sm:$0x1] %vm13_vm1, %v12_v5  }
  0x80   :  { %v18_v7 = vpop.permute.xlu0 %17  }
  0x81   :  { %20 = vst.msk [vmem:[#allocation0] sm:$0x1] %vm19_vm2, %v18_v7  }
  0x82   :  { %26 = vst.msk [vmem:[#allocation0] sm:$0x1] %vm25_vm3, %v24_v6  }
  0x89   :  { %v30_v8 = vld [vmem:[#allocation0] sm:$0x1] }
  0x8a   :  { %32 = vst [vmem:[%s56_s1] sm:$0x1] %v30_v8 }

// kernel: upsample_block.2
= control target key start
LH: loop header
LB: loop body
LE: loop exit
PB: predicated region body
PF: predicated region fallthrough
CT: control target
= control target key end

     0   :  { %s837_s9 = smov 0   ;;  %s1125_s0 = inlined_call_operand.vmem [shape: f32[512,4], index: 0, kind: input, shape index: {}]   ;;  %s1126_s1 = inlined_call_operand.vmem [shape: f32[4,1,4], index: 1, kind: output, shape index: {0}]   ;;  %s1127_s2 = inlined_call_operand.vmem [shape: f32[4,4,4], index: 2, kind: output, shape index: {1}]  }
   0x1 LB: > { %s843_s10 = sadd.s32 4294967295, %s816_s9   ;;  %p783_p0 = scmp.ge.s32.totalorder %s816_s9, 1  ;;  %s816_s9 = sphi %s837_s9, %s13_s9  }
   0x2   : > { %p116_p1 = scmp.lt.s32.totalorder %s816_s9, 5 }
   0x4   : > { %p117_p2 = pnand %p783_p0, %p116_p1 }
   0x5   : > { %s784_s11 = sshll.u32 (!%p117_p2), %s843_s10, 4  ;;  %v818_v0 = vmov (!%p117_p2), 0   ;;  %v819_v17 = vmov (!%p117_p2), 1   ;;  %v820_v18 = vmov (!%p117_p2), 2   ;;  %v821_v19 = vmov (!%p117_p2), 3   ;;  %p146_p4 = scmp.lt.s32.totalorder (!%p117_p2), %s843_s10, 3 }
   0x6   : > { %120 = sbr.rel (%p117_p2) target bundleno = 297 (0x129), region = 24  ;;  %802 = vset.pattern.permute.xlu1 (!%p117_p2), %v818_v0  ;;  %801 = vset.pattern.permute.xlu0 (!%p117_p2), %v818_v0  ;;  %p141_p3 = scmp.lt.s32.totalorder (!%p117_p2), %s784_s11, 63  ;;  %vm169_vm0 = vcmask (!%p117_p2), 31744   ;;  %vm207_vm1 = vcmask (!%p117_p2), 24576   ;;  %vm693_vm2 = vcmask (!%p117_p2), 1040384   ;;  %vm695_vm3 = vcmask (!%p117_p2), 1041408  }
   0x7   : > { %vm697_vm4 = vcmask (!%p117_p2), 1042432   ;;  %vm699_vm5 = vcmask (!%p117_p2), 27648  }
   0xd   : > { %s1129_s11 = smov (!%p141_p3, %s784_s11), 63  ;;  %s1131_s10 = smov (!%p146_p4, %s843_s10), 3 }
   0xe   : > { %s785_s12 = sshll.u32 %s1129_s11, 3  ;;  %s148_s18 = scalar_lea.vmem %s1126_s1, %s1131_s10 }
   0xf   : > { %s144_s15 = scalar_lea.vmem %s1125_s0, %s785_s12  ;;  %s786_s19 = sshll.u32 %s1131_s10, 2 }
  0x10   : > { %v851_v1 = vld [vmem:[%s144_s15 + $0x10] sm:$0xff]  ;;  %v853_v2 = vld [vmem:[%s144_s15] sm:$0xff]  ;;  %v857_v3 = vld [vmem:[%s144_s15 + $0x18] sm:$0xff]  ;;  %s152_s22 = scalar_lea.vmem %s1127_s2, %s786_s19 }
  0x11   : > { %221 = vperm.xlu1 %802, %v851_v1   ;;  %211 = vperm.xlu0 %801, %v853_v2   ;;  %v859_v4 = vld [vmem:[%s144_s15 + $0x8] sm:$0xff]  ;;  %v865_v6 = vld [vmem:[%s144_s15 + $0x20] sm:$0xff]  ;;  %v869_v7 = vld [vmem:[%s144_s15 + $0x38] sm:$0xff]  ;;  %v170_v20 = vsel %vm169_vm0, %v853_v2, 0.0  ;;  %v173_v23 = vsel %vm169_vm0, %v851_v1, 0.0  ;;  %v175_v25 = vsel %vm169_vm0, %v857_v3, 0.0 }
  0x12   : > { %v863_v5 = vld [vmem:[%s144_s15 + $0x28] sm:$0xff]  ;;  %v871_v8 = vld [vmem:[%s144_s15 + $0x30] sm:$0xff]  ;;  %v877_v10 = vld [vmem:[%s144_s15 + $0x40] sm:$0xff]  ;;  %v171_v21 = vsel %vm169_vm0, %v859_v4, 0.0  ;;  %v177_v27 = vsel %vm169_vm0, %v865_v6, 0.0  ;;  %v183_v33 = vsel %vm169_vm0, %v869_v7, 0.0 }
  0x13   : > { %v875_v9 = vld [vmem:[%s144_s15 + $0x48] sm:$0xff]  ;;  %v881_v11 = vld [vmem:[%s144_s15 + $0x58] sm:$0xff]  ;;  %v883_v12 = vld [vmem:[%s144_s15 + $0x50] sm:$0xff]  ;;  %v172_v22 = vadd.f32 %v171_v21, %v170_v20  ;;  %v179_v29 = vsel %vm169_vm0, %v863_v5, 0.0  ;;  %v181_v31 = vsel %vm169_vm0, %v871_v8, 0.0  ;;  %v185_v35 = vsel %vm169_vm0, %v877_v10, 0.0 }
  0x14   : > { %v887_v13 = vld [vmem:[%s144_s15 + $0x68] sm:$0xff]  ;;  %v889_v14 = vld [vmem:[%s144_s15 + $0x60] sm:$0xff]  ;;  %v893_v15 = vld [vmem:[%s144_s15 + $0x78] sm:$0xff]  ;;  %v187_v37 = vsel %vm169_vm0, %v875_v9, 0.0  ;;  %v189_v39 = vsel %vm169_vm0, %v883_v12, 0.0  ;;  %v191_v41 = vsel %vm169_vm0, %v881_v11, 0.0 }
  0x15   : > { %226 = vperm.xlu1 %802, %v857_v3   ;;  %216 = vperm.xlu0 %801, %v859_v4   ;;  %v895_v16 = vld [vmem:[%s144_s15 + $0x70] sm:$0xff]  ;;  %v174_v24 = vadd.f32 %v173_v23, %v172_v22  ;;  %v193_v43 = vsel %vm169_vm0, %v889_v14, 0.0  ;;  %v195_v48 = vsel %vm169_vm0, %v887_v13, 0.0  ;;  %v199_v0 = vsel %vm169_vm0, %v893_v15, 0.0 }
  0x16   : > { %v197_v51 = vsel %vm169_vm0, %v895_v16, 0.0 }
  0x17   : > { %v176_v26 = vadd.f32 %v175_v25, %v174_v24 }
  0x19   : > { %236 = vperm.xlu1 %802, %v863_v5   ;;  %231 = vperm.xlu0 %801, %v865_v6   ;;  %v178_v28 = vadd.f32 %v177_v27, %v176_v26 }
  0x1b   : > { %v180_v30 = vadd.f32 %v179_v29, %v178_v28 }
  0x1d   : > { %246 = vperm.xlu1 %802, %v869_v7   ;;  %241 = vperm.xlu0 %801, %v871_v8   ;;  %v182_v32 = vadd.f32 %v181_v31, %v180_v30 }
  0x1f   : > { %v184_v34 = vadd.f32 %v183_v33, %v182_v32 }
  0x21   : > { %256 = vperm.xlu1 %802, %v875_v9   ;;  %251 = vperm.xlu0 %801, %v877_v10   ;;  %v186_v36 = vadd.f32 %v185_v35, %v184_v34 }
  0x23   : > { %v188_v38 = vadd.f32 %v187_v37, %v186_v36 }
  0x25   : > { %266 = vperm.xlu1 %802, %v881_v11   ;;  %261 = vperm.xlu0 %801, %v883_v12   ;;  %v190_v40 = vadd.f32 %v189_v39, %v188_v38 }
  0x27   : > { %v192_v42 = vadd.f32 %v191_v41, %v190_v40 }
  0x29   : > { %276 = vperm.xlu1 %802, %v887_v13   ;;  %271 = vperm.xlu0 %801, %v889_v14   ;;  %v194_v47 = vadd.f32 %v193_v43, %v192_v42 }
  0x2b   : > { %v196_v55 = vadd.f32 %v195_v48, %v194_v47 }
  0x2d   : > { %286 = vperm.xlu1 %802, %v893_v15   ;;  %281 = vperm.xlu0 %801, %v895_v16   ;;  %v198_v61 = vadd.f32 %v197_v51, %v196_v55 }
  0x31   : > { %804 = vset.pattern.permute.xlu1 %v819_v17  ;;  %803 = vset.pattern.permute.xlu0 %v819_v17 }
  0x32   : > { %347 = vperm.xlu1 %804, %v859_v4   ;;  %343 = vperm.xlu0 %803, %v853_v2  }
  0x36   : > { %351 = vperm.xlu1 %804, %v851_v1   ;;  %355 = vperm.xlu0 %803, %v857_v3  }
  0x3a   : > { %359 = vperm.xlu1 %804, %v865_v6   ;;  %363 = vperm.xlu0 %803, %v863_v5  }
  0x3e   : > { %367 = vperm.xlu1 %804, %v871_v8   ;;  %371 = vperm.xlu0 %803, %v869_v7  }
  0x42   : > { %375 = vperm.xlu1 %804, %v877_v10   ;;  %379 = vperm.xlu0 %803, %v875_v9  }
  0x46   : > { %383 = vperm.xlu1 %804, %v883_v12   ;;  %387 = vperm.xlu0 %803, %v881_v11  }
  0x4a   : > { %391 = vperm.xlu1 %804, %v889_v14   ;;  %395 = vperm.xlu0 %803, %v887_v13  }
  0x4e   : > { %399 = vperm.xlu1 %804, %v895_v16   ;;  %403 = vperm.xlu0 %803, %v893_v15  }
  0x52   : > { %805 = vset.pattern.permute.xlu1 %v820_v18  ;;  %806 = vset.pattern.permute.xlu0 %v820_v18 }
  0x53   : > { %460 = vperm.xlu1 %805, %v853_v2   ;;  %464 = vperm.xlu0 %806, %v859_v4  }
  0x57   : > { %468 = vperm.xlu1 %805, %v851_v1   ;;  %476 = vperm.xlu0 %806, %v865_v6  }
  0x5b   : > { %472 = vperm.xlu1 %805, %v857_v3   ;;  %808 = vset.pattern.permute.xlu0 %v821_v19 }
  0x5c   : > { %581 = vperm.xlu0 %808, %v859_v4  }
  0x5f   : > { %807 = vset.pattern.permute.xlu1 %v821_v19 }
  0x60   : > { %577 = vperm.xlu1 %807, %v853_v2   ;;  %593 = vperm.xlu0 %808, %v865_v6  }
  0x64   : > { %585 = vperm.xlu1 %807, %v851_v1   ;;  %597 = vperm.xlu0 %808, %v863_v5  }
  0x68   : > { %589 = vperm.xlu1 %807, %v857_v3   ;;  %601 = vperm.xlu0 %808, %v871_v8  }
  0x6c   : > { %809 = vset.pattern.permute.xlu1 %v820_v18  ;;  %605 = vperm.xlu0 %808, %v869_v7   ;;  %v200_v18 = vadd.f32 %v199_v0, %v198_v61 }
  0x6d   : > { %480 = vperm.xlu1 %809, %v863_v5  }
  0x6e   : > { %v201_v25 = vrot.slane %v200_v18, 4 }
  0x70   : > { %609 = vperm.xlu0 %808, %v877_v10   ;;  %v202_v28 = vadd.f32 %v201_v25, %v200_v18 }
  0x71   : > { %484 = vperm.xlu1 %809, %v871_v8  }
  0x72   : > { %v203_v34 = vrot.slane %v202_v28, 2 }
  0x74   : > { %613 = vperm.xlu0 %808, %v875_v9   ;;  %v204_v38 = vadd.f32 %v203_v34, %v202_v28 }
  0x75   : > { %488 = vperm.xlu1 %809, %v869_v7  }
  0x78   : > { %617 = vperm.xlu0 %808, %v883_v12  }
  0x79   : > { %492 = vperm.xlu1 %809, %v877_v10  }
  0x7c   : > { %621 = vperm.xlu0 %808, %v881_v11  }
  0x7d   : > { %496 = vperm.xlu1 %809, %v875_v9  }
  0x80   : > { %625 = vperm.xlu0 %808, %v889_v14  }
  0x81   : > { %500 = vperm.xlu1 %809, %v883_v12  }
  0x84   : > { %629 = vperm.xlu0 %808, %v887_v13  }
  0x85   : > { %504 = vperm.xlu1 %809, %v881_v11  }
  0x88   : > { %633 = vperm.xlu0 %808, %v895_v16  }
  0x89   : > { %508 = vperm.xlu1 %809, %v889_v14  }
  0x8c   : > { %637 = vperm.xlu0 %808, %v893_v15  }
  0x8d   : > { %512 = vperm.xlu1 %809, %v887_v13  }
  0x90   : > { %v222_v44 = vpop.permute.xlu1 %221  ;;  %v212_v45 = vpop.permute.xlu0 %211 }
  0x91   : > { %v289_v46 = vmul.f32 %v212_v45, %v853_v2  ;;  %516 = vperm.xlu1 %809, %v895_v16   ;;  %v291_v52 = vmul.f32 %v222_v44, %v851_v1  ;;  %v205_v44 = vrot.slane %v204_v38, 1 }
  0x93   : > { %v305_v53 = vsel %vm169_vm0, %v289_v46, 0.0  ;;  %v308_v62 = vsel %vm169_vm0, %v291_v52, 0.0  ;;  %v206_v48 = vadd.f32 %v205_v44, %v204_v38 }
  0x94   : > { %v227_v49 = vpop.permute.xlu1 %226  ;;  %v217_v50 = vpop.permute.xlu0 %216 }
  0x95   : > { %v290_v54 = vmul.f32 %v217_v50, %v859_v4  ;;  %520 = vperm.xlu1 %809, %v893_v15   ;;  %v292_v56 = vmul.f32 %v227_v49, %v857_v3  ;;  %208 = vst.msk [vmem:[%s148_s18] sm:$0x1] %vm207_vm1, %v206_v48 }
  0x97   : > { %v306_v57 = vsel %vm169_vm0, %v290_v54, 0.0  ;;  %v310_v19 = vsel %vm169_vm0, %v292_v56, 0.0 }
  0x98   : > { %v307_v58 = vadd.f32 %v306_v57, %v305_v53  ;;  %v237_v59 = vpop.permute.xlu1 %236  ;;  %v232_v60 = vpop.permute.xlu0 %231 }
  0x99   : > { %v293_v63 = vmul.f32 %v232_v60, %v865_v6  ;;  %v294_v20 = vmul.f32 %v237_v59, %v863_v5 }
  0x9a   : > { %v309_v17 = vadd.f32 %v308_v62, %v307_v58 }
  0x9b   : > { %v312_v21 = vsel %vm169_vm0, %v293_v63, 0.0  ;;  %v314_v29 = vsel %vm169_vm0, %v294_v20, 0.0 }
  0x9c   : > { %v311_v22 = vadd.f32 %v310_v19, %v309_v17  ;;  %v247_v23 = vpop.permute.xlu1 %246  ;;  %v242_v24 = vpop.permute.xlu0 %241 }
  0x9d   : > { %v295_v26 = vmul.f32 %v242_v24, %v871_v8  ;;  %v296_v30 = vmul.f32 %v247_v23, %v869_v7 }
  0x9e   : > { %v313_v27 = vadd.f32 %v312_v21, %v311_v22 }
  0x9f   : > { %v316_v35 = vsel %vm169_vm0, %v295_v26, 0.0  ;;  %v318_v39 = vsel %vm169_vm0, %v296_v30, 0.0 }
  0xa0   : > { %v315_v31 = vadd.f32 %v314_v29, %v313_v27  ;;  %v257_v32 = vpop.permute.xlu1 %256  ;;  %v252_v33 = vpop.permute.xlu0 %251 }
  0xa1   : > { %v297_v36 = vmul.f32 %v252_v33, %v877_v10  ;;  %v298_v40 = vmul.f32 %v257_v32, %v875_v9 }
  0xa2   : > { %v317_v37 = vadd.f32 %v316_v35, %v315_v31 }
  0xa3   : > { %v320_v45 = vsel %vm169_vm0, %v297_v36, 0.0  ;;  %v322_v49 = vsel %vm169_vm0, %v298_v40, 0.0 }
  0xa4   : > { %v319_v41 = vadd.f32 %v318_v39, %v317_v37  ;;  %v267_v42 = vpop.permute.xlu1 %266  ;;  %v262_v43 = vpop.permute.xlu0 %261 }
  0xa5   : > { %v299_v46 = vmul.f32 %v262_v43, %v883_v12  ;;  %v300_v50 = vmul.f32 %v267_v42, %v881_v11 }
  0xa6   : > { %v321_v47 = vadd.f32 %v320_v45, %v319_v41 }
  0xa7   : > { %v324_v54 = vsel %vm169_vm0, %v299_v46, 0.0  ;;  %v326_v57 = vsel %vm169_vm0, %v300_v50, 0.0 }
  0xa8   : > { %v323_v51 = vadd.f32 %v322_v49, %v321_v47  ;;  %v277_v52 = vpop.permute.xlu1 %276  ;;  %v272_v53 = vpop.permute.xlu0 %271 }
  0xa9   : > { %v301_v55 = vmul.f32 %v272_v53, %v889_v14  ;;  %v302_v58 = vmul.f32 %v277_v52, %v887_v13 }
  0xaa   : > { %v325_v56 = vadd.f32 %v324_v54, %v323_v51 }
  0xab   : > { %v328_v62 = vsel %vm169_vm0, %v301_v55, 0.0  ;;  %v330_v17 = vsel %vm169_vm0, %v302_v58, 0.0 }
  0xac   : > { %v327_v59 = vadd.f32 %v326_v57, %v325_v56  ;;  %v287_v60 = vpop.permute.xlu1 %286  ;;  %v282_v61 = vpop.permute.xlu0 %281 }
  0xad   : > { %v303_v63 = vmul.f32 %v282_v61, %v895_v16  ;;  %v304_v18 = vmul.f32 %v287_v60, %v893_v15 }
  0xae   : > { %v329_v0 = vadd.f32 %v328_v62, %v327_v59 }
  0xaf   : > { %v332_v20 = vsel %vm169_vm0, %v303_v63, 0.0  ;;  %v334_v26 = vsel %vm169_vm0, %v304_v18, 0.0 }
  0xb0   : > { %v331_v19 = vadd.f32 %v330_v17, %v329_v0 }
  0xb1   : > { %v348_v21 = vpop.permute.xlu1 %347  ;;  %v344_v22 = vpop.permute.xlu0 %343 }
  0xb2   : > { %v333_v23 = vadd.f32 %v332_v20, %v331_v19  ;;  %v407_v24 = vmul.f32 %v348_v21, %v859_v4  ;;  %v406_v25 = vmul.f32 %v344_v22, %v853_v2 }
  0xb4   : > { %v335_v27 = vadd.f32 %v334_v26, %v333_v23  ;;  %v423_v28 = vsel %vm169_vm0, %v407_v24, 0.0  ;;  %v422_v29 = vsel %vm169_vm0, %v406_v25, 0.0 }
  0xb5   : > { %v352_v30 = vpop.permute.xlu1 %351  ;;  %v356_v31 = vpop.permute.xlu0 %355  ;;  %v424_v34 = vadd.f32 %v423_v28, %v422_v29 }
  0xb6   : > { %v408_v32 = vmul.f32 %v352_v30, %v851_v1  ;;  %v409_v33 = vmul.f32 %v356_v31, %v857_v3  ;;  %v336_v26 = vrot.slane %v335_v27, 4 }
  0xb8   : > { %v425_v35 = vsel %vm169_vm0, %v408_v32, 0.0  ;;  %v427_v36 = vsel %vm169_vm0, %v409_v33, 0.0 }
  0xb9   : > { %v426_v37 = vadd.f32 %v425_v35, %v424_v34  ;;  %v360_v38 = vpop.permute.xlu1 %359  ;;  %v364_v39 = vpop.permute.xlu0 %363 }
  0xba   : > { %v410_v40 = vmul.f32 %v360_v38, %v865_v6  ;;  %v411_v41 = vmul.f32 %v364_v39, %v863_v5 }
  0xbb   : > { %v428_v42 = vadd.f32 %v427_v36, %v426_v37  ;;  %v337_v36 = vadd.f32 %v336_v26, %v335_v27 }
  0xbc   : > { %v429_v43 = vsel %vm169_vm0, %v410_v40, 0.0  ;;  %v431_v44 = vsel %vm169_vm0, %v411_v41, 0.0 }
  0xbd   : > { %v430_v45 = vadd.f32 %v429_v43, %v428_v42  ;;  %v368_v46 = vpop.permute.xlu1 %367  ;;  %v372_v47 = vpop.permute.xlu0 %371  ;;  %v338_v43 = vrot.slane %v337_v36, 2 }
  0xbe   : > { %v412_v48 = vmul.f32 %v368_v46, %v871_v8  ;;  %v413_v49 = vmul.f32 %v372_v47, %v869_v7 }
  0xbf   : > { %v432_v50 = vadd.f32 %v431_v44, %v430_v45 }
  0xc0   : > { %v433_v51 = vsel %vm169_vm0, %v412_v48, 0.0  ;;  %v435_v55 = vsel %vm169_vm0, %v413_v49, 0.0  ;;  %v339_v48 = vadd.f32 %v338_v43, %v337_v36 }
  0xc1   : > { %v434_v52 = vadd.f32 %v433_v51, %v432_v50  ;;  %v376_v53 = vpop.permute.xlu1 %375  ;;  %v380_v54 = vpop.permute.xlu0 %379 }
  0xc2   : > { %v414_v56 = vmul.f32 %v376_v53, %v877_v10  ;;  %v415_v57 = vmul.f32 %v380_v54, %v875_v9 }
  0xc3   : > { %v436_v58 = vadd.f32 %v435_v55, %v434_v52  ;;  %v340_v52 = vrot.slane %v339_v48, 1 }
  0xc4   : > { %v437_v59 = vsel %vm169_vm0, %v414_v56, 0.0  ;;  %v439_v63 = vsel %vm169_vm0, %v415_v57, 0.0 }
  0xc5   : > { %v438_v60 = vadd.f32 %v437_v59, %v436_v58  ;;  %v384_v61 = vpop.permute.xlu1 %383  ;;  %v388_v62 = vpop.permute.xlu0 %387  ;;  %v341_v55 = vadd.f32 %v340_v52, %v339_v48 }
  0xc6   : > { %v416_v0 = vmul.f32 %v384_v61, %v883_v12  ;;  %v417_v17 = vmul.f32 %v388_v62, %v881_v11 }
  0xc7   : > { %v440_v18 = vadd.f32 %v439_v63, %v438_v60 }
  0xc8   : > { %v441_v19 = vsel %vm169_vm0, %v416_v0, 0.0  ;;  %v443_v23 = vsel %vm169_vm0, %v417_v17, 0.0 }
  0xc9   : > { %v442_v20 = vadd.f32 %v441_v19, %v440_v18  ;;  %v392_v21 = vpop.permute.xlu1 %391  ;;  %v396_v22 = vpop.permute.xlu0 %395 }
  0xca   : > { %v418_v24 = vmul.f32 %v392_v21, %v889_v14  ;;  %v419_v25 = vmul.f32 %v396_v22, %v887_v13 }
  0xcb   : > { %v444_v28 = vadd.f32 %v443_v23, %v442_v20 }
  0xcc   : > { %v445_v29 = vsel %vm169_vm0, %v418_v24, 0.0  ;;  %v447_v33 = vsel %vm169_vm0, %v419_v25, 0.0 }
  0xcd   : > { %v446_v30 = vadd.f32 %v445_v29, %v444_v28  ;;  %v400_v31 = vpop.permute.xlu1 %399  ;;  %v404_v32 = vpop.permute.xlu0 %403 }
  0xce   : > { %v420_v34 = vmul.f32 %v400_v31, %v895_v16  ;;  %v421_v35 = vmul.f32 %v404_v32, %v893_v15 }
  0xcf   : > { %v448_v37 = vadd.f32 %v447_v33, %v446_v30 }
  0xd0   : > { %v449_v38 = vsel %vm169_vm0, %v420_v34, 0.0  ;;  %v451_v40 = vsel %vm169_vm0, %v421_v35, 0.0 }
  0xd1   : > { %v450_v39 = vadd.f32 %v449_v38, %v448_v37 }
  0xd2   : > { %v461_v41 = vpop.permute.xlu1 %460  ;;  %v465_v42 = vpop.permute.xlu0 %464 }
  0xd3   : > { %v452_v44 = vadd.f32 %v451_v40, %v450_v39  ;;  %v523_v38 = vmul.f32 %v461_v41, %v853_v2  ;;  %v524_v39 = vmul.f32 %v465_v42, %v859_v4 }
  0xd5   : > { %v453_v45 = vrot.slane %v452_v44, 4  ;;  %v540_v52 = vsel %vm169_vm0, %v524_v39, 0.0 }
  0xd6   : > { %v469_v46 = vpop.permute.xlu1 %468  ;;  %v477_v47 = vpop.permute.xlu0 %476 }
  0xd7   : > { %v454_v49 = vadd.f32 %v453_v45, %v452_v44  ;;  %v525_v45 = vmul.f32 %v469_v46, %v851_v1  ;;  %v527_v46 = vmul.f32 %v477_v47, %v865_v6 }
  0xd9   : > { %v455_v50 = vrot.slane %v454_v49, 2 }
  0xda   : > { %v473_v51 = vpop.permute.xlu1 %472 }
  0xdb   : > { %v456_v53 = vadd.f32 %v455_v50, %v454_v49  ;;  %v582_v27 = vpop.permute.xlu0 %581  ;;  %v539_v50 = vsel %vm169_vm0, %v523_v38, 0.0 }
  0xdc   : > { %v641_v59 = vmul.f32 %v582_v27, %v859_v4  ;;  %v542_v4 = vsel %vm169_vm0, %v525_v45, 0.0  ;;  %v541_v41 = vadd.f32 %v540_v52, %v539_v50 }
  0xdd   : > { %v457_v54 = vrot.slane %v456_v53, 1 }
  0xde   : > { %v657_v0 = vsel %vm169_vm0, %v641_v59, 0.0 }
  0xdf   : > { %v458_v56 = vadd.f32 %v457_v54, %v456_v53  ;;  %v578_v57 = vpop.permute.xlu1 %577  ;;  %v594_v58 = vpop.permute.xlu0 %593  ;;  %v526_v53 = vmul.f32 %v473_v51, %v857_v3 }
  0xe0   : > { %v640_v60 = vmul.f32 %v578_v57, %v853_v2  ;;  %v644_v25 = vmul.f32 %v594_v58, %v865_v6  ;;  %v543_v58 = vadd.f32 %v542_v4, %v541_v41 }
  0xe1   : > { %v1053_v61 = vsel %vm693_vm2, %v341_v55, %v458_v56  ;;  %v544_v55 = vsel %vm169_vm0, %v526_v53, 0.0 }
  0xe2   : > { %v656_v17 = vsel %vm169_vm0, %v640_v60, 0.0  ;;  %v663_v31 = vsel %vm169_vm0, %v644_v25, 0.0  ;;  %v545_v60 = vadd.f32 %v544_v55, %v543_v58 }
  0xe3   : > { %v586_v62 = vpop.permute.xlu1 %585  ;;  %v598_v63 = vpop.permute.xlu0 %597  ;;  %v658_v20 = vadd.f32 %v657_v0, %v656_v17  ;;  %v546_v0 = vsel %vm169_vm0, %v527_v46, 0.0 }
  0xe4   : > { %v642_v18 = vmul.f32 %v586_v62, %v851_v1  ;;  %v645_v32 = vmul.f32 %v598_v63, %v863_v5 }
  0xe6   : > { %v659_v19 = vsel %vm169_vm0, %v642_v18, 0.0  ;;  %v665_v36 = vsel %vm169_vm0, %v645_v32, 0.0 }
  0xe7   : > { %v590_v21 = vpop.permute.xlu1 %589  ;;  %v602_v22 = vpop.permute.xlu0 %601  ;;  %v660_v24 = vadd.f32 %v659_v19, %v658_v20 }
  0xe8   : > { %v643_v23 = vmul.f32 %v590_v21, %v857_v3  ;;  %v646_v37 = vmul.f32 %v602_v22, %v871_v8  ;;  %v547_v22 = vadd.f32 %v546_v0, %v545_v60 }
  0xea   : > { %v661_v26 = vsel %vm169_vm0, %v643_v23, 0.0  ;;  %v667_v48 = vsel %vm169_vm0, %v646_v37, 0.0 }
  0xeb   : > { %v662_v28 = vadd.f32 %v661_v26, %v660_v24  ;;  %v606_v29 = vpop.permute.xlu0 %605 }
  0xec   : > { %v481_v30 = vpop.permute.xlu1 %480  ;;  %v647_v49 = vmul.f32 %v606_v29, %v869_v7 }
  0xed   : > { %v664_v33 = vadd.f32 %v663_v31, %v662_v28  ;;  %v528_v51 = vmul.f32 %v481_v30, %v863_v5 }
  0xee   : > { %v669_v42 = vsel %vm169_vm0, %v647_v49, 0.0 }
  0xef   : > { %v610_v34 = vpop.permute.xlu0 %609  ;;  %v666_v40 = vadd.f32 %v665_v36, %v664_v33  ;;  %v548_v21 = vsel %vm169_vm0, %v528_v51, 0.0 }
  0xf0   : > { %v485_v35 = vpop.permute.xlu1 %484  ;;  %v648_v1 = vmul.f32 %v610_v34, %v877_v10  ;;  %v549_v29 = vadd.f32 %v548_v21, %v547_v22 }
  0xf1   : > { %v668_v27 = vadd.f32 %v667_v48, %v666_v40  ;;  %v529_v6 = vmul.f32 %v485_v35, %v871_v8 }
  0xf2   : > { %v671_v62 = vsel %vm169_vm0, %v648_v1, 0.0 }
  0xf3   : > { %v614_v43 = vpop.permute.xlu0 %613  ;;  %v670_v56 = vadd.f32 %v669_v42, %v668_v27  ;;  %v550_v25 = vsel %vm169_vm0, %v529_v6, 0.0 }
  0xf4   : > { %v489_v44 = vpop.permute.xlu1 %488  ;;  %v649_v59 = vmul.f32 %v614_v43, %v875_v9  ;;  %v551_v35 = vadd.f32 %v550_v25, %v549_v29 }
  0xf5   : > { %v672_v17 = vadd.f32 %v671_v62, %v670_v56  ;;  %v530_v5 = vmul.f32 %v489_v44, %v869_v7 }
  0xf6   : > { %v673_v18 = vsel %vm169_vm0, %v649_v59, 0.0 }
  0xf7   : > { %v618_v54 = vpop.permute.xlu0 %617  ;;  %v674_v26 = vadd.f32 %v673_v18, %v672_v17  ;;  %v552_v33 = vsel %vm169_vm0, %v530_v5, 0.0 }
  0xf8   : > { %v493_v2 = vpop.permute.xlu1 %492  ;;  %v650_v63 = vmul.f32 %v618_v54, %v883_v12  ;;  %v553_v40 = vadd.f32 %v552_v33, %v551_v35 }
  0xf9   : > { %v531_v8 = vmul.f32 %v493_v2, %v877_v10 }
  0xfa   : > { %v675_v23 = vsel %vm169_vm0, %v650_v63, 0.0 }
  0xfb   : > { %v622_v57 = vpop.permute.xlu0 %621  ;;  %v676_v7 = vadd.f32 %v675_v23, %v674_v26  ;;  %v554_v37 = vsel %vm169_vm0, %v531_v8, 0.0 }
  0xfc   : > { %v497_v3 = vpop.permute.xlu1 %496  ;;  %v651_v19 = vmul.f32 %v622_v57, %v881_v11  ;;  %v555_v50 = vadd.f32 %v554_v37, %v553_v40 }
  0xfd   : > { %v532_v34 = vmul.f32 %v497_v3, %v875_v9 }
  0xfe   : > { %v677_v30 = vsel %vm169_vm0, %v651_v19, 0.0 }
  0xff   : > { %v626_v47 = vpop.permute.xlu0 %625  ;;  %v678_v38 = vadd.f32 %v677_v30, %v676_v7  ;;  %v556_v48 = vsel %vm169_vm0, %v532_v34, 0.0 }
 0x100   : > { %v501_v20 = vpop.permute.xlu1 %500  ;;  %v652_v24 = vmul.f32 %v626_v47, %v889_v14  ;;  %v557_v2 = vadd.f32 %v556_v48, %v555_v50 }
 0x101   : > { %v533_v10 = vmul.f32 %v501_v20, %v883_v12 }
 0x102   : > { %v679_v36 = vsel %vm169_vm0, %v652_v24, 0.0 }
 0x103   : > { %v630_v28 = vpop.permute.xlu0 %629  ;;  %v680_v49 = vadd.f32 %v679_v36, %v678_v38  ;;  %v558_v53 = vsel %vm169_vm0, %v533_v10, 0.0 }
 0x104   : > { %v653_v31 = vmul.f32 %v630_v28, %v887_v13  ;;  %v505_v32 = vpop.permute.xlu1 %504  ;;  %v559_v55 = vadd.f32 %v558_v53, %v557_v2 }
 0x105   : > { %v534_v9 = vmul.f32 %v505_v32, %v881_v11 }
 0x106   : > { %v681_v43 = vsel %vm169_vm0, %v653_v31, 0.0 }
 0x107   : > { %v634_v39 = vpop.permute.xlu0 %633  ;;  %v682_v27 = vadd.f32 %v681_v43, %v680_v49  ;;  %v560_v42 = vsel %vm169_vm0, %v534_v9, 0.0 }
 0x108   : > { %v654_v44 = vmul.f32 %v634_v39, %v895_v16  ;;  %v509_v45 = vpop.permute.xlu1 %508  ;;  %v561_v58 = vadd.f32 %v560_v42, %v559_v55 }
 0x109   : > { %v535_v12 = vmul.f32 %v509_v45, %v889_v14 }
 0x10a   : > { %v683_v52 = vsel %vm169_vm0, %v654_v44, 0.0 }
 0x10b   : > { %v638_v54 = vpop.permute.xlu0 %637  ;;  %v684_v1 = vadd.f32 %v683_v52, %v682_v27  ;;  %v562_v56 = vsel %vm169_vm0, %v535_v12, 0.0 }
 0x10c   : > { %v655_v4 = vmul.f32 %v638_v54, %v893_v15  ;;  %v513_v41 = vpop.permute.xlu1 %512  ;;  %v563_v60 = vadd.f32 %v562_v56, %v561_v58 }
 0x10d   : > { %v536_v46 = vmul.f32 %v513_v41, %v887_v13 }
 0x10e   : > { %v685_v11 = vsel %vm169_vm0, %v655_v4, 0.0 }
 0x10f   : > { %v686_v57 = vadd.f32 %v685_v11, %v684_v1  ;;  %v564_v14 = vsel %vm169_vm0, %v536_v46, 0.0 }
 0x110   : > { %v517_v59 = vpop.permute.xlu1 %516  ;;  %v565_v63 = vadd.f32 %v564_v14, %v563_v60 }
 0x111   : > { %v687_v3 = vrot.slane %v686_v57, 4  ;;  %v537_v51 = vmul.f32 %v517_v59, %v895_v16 }
 0x113   : > { %v566_v62 = vsel %vm169_vm0, %v537_v51, 0.0  ;;  %v688_v13 = vadd.f32 %v687_v3, %v686_v57 }
 0x114   : > { %v521_v0 = vpop.permute.xlu1 %520  ;;  %v567_v6 = vadd.f32 %v566_v62, %v565_v63 }
 0x115   : > { %v538_v17 = vmul.f32 %v521_v0, %v893_v15  ;;  %v689_v19 = vrot.slane %v688_v13, 2 }
 0x117   : > { %v568_v47 = vsel %vm169_vm0, %v538_v17, 0.0  ;;  %v690_v5 = vadd.f32 %v689_v19, %v688_v13 }
 0x118   : > { %v569_v18 = vadd.f32 %v568_v47, %v567_v6 }
 0x119   : > { %v691_v16 = vrot.slane %v690_v5, 1 }
 0x11a   : > { %v570_v20 = vrot.slane %v569_v18, 4 }
 0x11b   : > { %v692_v26 = vadd.f32 %v691_v16, %v690_v5 }
 0x11c   : > { %v571_v21 = vadd.f32 %v570_v20, %v569_v18 }
 0x11e   : > { %v572_v22 = vrot.slane %v571_v21, 2 }
 0x120   : > { %v573_v23 = vadd.f32 %v572_v22, %v571_v21 }
 0x122   : > { %v574_v24 = vrot.slane %v573_v23, 1 }
 0x124   : > { %v575_v25 = vadd.f32 %v574_v24, %v573_v23 }
 0x126   : > { %v696_v15 = vsel %vm695_vm3, %v1053_v61, %v575_v25 }
 0x127   : > { %v698_v8 = vsel %vm697_vm4, %v696_v15, %v692_v26 }
 0x128   : > { %700 = vst.msk [vmem:[%s152_s22] sm:$0xf] %vm699_vm5, %v698_v8 }
 0x129 PF: > { %s13_s9 = sadd.s32 1, %s816_s9  }
 0x12a   : > { %p10_p5 = scmp.ge.s32.totalorder %s13_s9, 6  }
 0x12c   :  { %12 = sbr.rel (!%p10_p5) target bundleno = 1 (0x1), region = 66 }

// kernel: upsample_block.3
= control target key start
LH: loop header
LB: loop body
LE: loop exit
PB: predicated region body
PF: predicated region fallthrough
CT: control target
= control target key end

     0   :  { %s999_s15 = smov 0   ;;  %s1396_s0 = inlined_call_operand.vmem [shape: f32[512,4], index: 0, kind: input, shape index: {}]   ;;  %s1397_s1 = inlined_call_operand.vmem [shape: f32[4,32], index: 1, kind: input, shape index: {}]   ;;  %s1398_s2 = inlined_call_operand.vmem [shape: f32[1,32], index: 2, kind: input, shape index: {}]   ;;  %s1399_s3 = inlined_call_operand.vmem [shape: f32[1,32], index: 3, kind: input, shape index: {}]   ;;  %s1400_s4 = inlined_call_operand.vmem [shape: f32[512,32], index: 4, kind: output, shape index: {}]  }
   0x1 LB: > { %s849_s16 = sadd.s32 4294967295, %s968_s15   ;;  %p853_p0 = scmp.ge.s32.totalorder %s968_s15, 1  ;;  %s968_s15 = sphi %s999_s15, %s14_s15  }
   0x2   : > { %p163_p1 = scmp.lt.s32.totalorder %s968_s15, 5 }
   0x4   : > { %p164_p2 = pnand %p853_p0, %p163_p1 }
   0x5   : > { %s854_s17 = sshll.u32 (!%p164_p2), %s849_s16, 4  ;;  %v970_v0 = vmov (!%p164_p2), 0   ;;  %v971_v17 = vmov (!%p164_p2), 1   ;;  %v972_v18 = vmov (!%p164_p2), 2   ;;  %v973_v19 = vmov (!%p164_p2), 3  }
   0x6   : > { %167 = sbr.rel (%p164_p2) target bundleno = 314 (0x13a), region = 36  ;;  %891 = vset.pattern.permute.xlu1 (!%p164_p2), %v970_v0  ;;  %890 = vset.pattern.permute.xlu0 (!%p164_p2), %v970_v0  ;;  %p190_p3 = scmp.lt.s32.totalorder (!%p164_p2), %s854_s17, 63  ;;  %v298_v30 = vlaneseq (!%p164_p2)  ;;  %v1104_v40 = vld [vmem:[%s1397_s1] sm:$0xf] (!%p164_p2)  ;;  %vm776_vm0 = vcmask (!%p164_p2), 261120  }
   0x8   : > { %v1093_v33 = vshrl.u32 (!%p164_p2), %v298_v30, 7 }
   0xa   : > { %v384_v36 = vsub.s32 (!%p164_p2), 1, %v1093_v33  ;;  %v300_v37 = vsub.s32 (!%p164_p2), 0, %v1093_v33 }
   0xc   : > { %v1107_v41 = vrot.slane (!%p164_p2), %v1104_v40, %v384_v36  ;;  %v1110_v42 = vrot.slane (!%p164_p2), %v1104_v40, %v300_v37  ;;  %v484_v37 = vsub.s32 (!%p164_p2), 2, %v1093_v33 }
   0xd   : > { %s1402_s17 = smov (!%p190_p3, %s854_s17), 63 }
   0xe   : > { %s855_s18 = sshll.u32 %s1402_s17, 3 }
   0xf   : > { %s193_s21 = scalar_lea.vmem %s1396_s0, %s855_s18  ;;  %s1324_s30 = scalar_lea.vmem %s1400_s4, %s855_s18 }
  0x10   : > { %v1015_v1 = vld [vmem:[%s193_s21 + $0x10] sm:$0xff]  ;;  %v1017_v2 = vld [vmem:[%s193_s21] sm:$0xff]  ;;  %v1021_v3 = vld [vmem:[%s193_s21 + $0x18] sm:$0xff] }
  0x11   : > { %230 = vperm.xlu1 %891, %v1015_v1   ;;  %220 = vperm.xlu0 %890, %v1017_v2   ;;  %v1023_v4 = vld [vmem:[%s193_s21 + $0x8] sm:$0xff]  ;;  %v1029_v6 = vld [vmem:[%s193_s21 + $0x20] sm:$0xff]  ;;  %v1033_v7 = vld [vmem:[%s193_s21 + $0x38] sm:$0xff] }
  0x12   : > { %v1027_v5 = vld [vmem:[%s193_s21 + $0x28] sm:$0xff]  ;;  %v1035_v8 = vld [vmem:[%s193_s21 + $0x30] sm:$0xff]  ;;  %v1041_v10 = vld [vmem:[%s193_s21 + $0x40] sm:$0xff] }
  0x13   : > { %v1039_v9 = vld [vmem:[%s193_s21 + $0x48] sm:$0xff]  ;;  %v212_v11 = vld [vmem:[%s193_s21 + $0x58] sm:$0xff]  ;;  %v1045_v12 = vld [vmem:[%s193_s21 + $0x50] sm:$0xff] }
  0x14   : > { %v214_v13 = vld [vmem:[%s193_s21 + $0x68] sm:$0xff]  ;;  %v213_v14 = vld [vmem:[%s193_s21 + $0x60] sm:$0xff]  ;;  %v216_v15 = vld [vmem:[%s193_s21 + $0x78] sm:$0xff] }
  0x15   : > { %235 = vperm.xlu1 %891, %v1021_v3   ;;  %225 = vperm.xlu0 %890, %v1023_v4   ;;  %v215_v16 = vld [vmem:[%s193_s21 + $0x70] sm:$0xff] }
  0x19   : > { %245 = vperm.xlu1 %891, %v1027_v5   ;;  %240 = vperm.xlu0 %890, %v1029_v6  }
  0x1d   : > { %255 = vperm.xlu1 %891, %v1033_v7   ;;  %250 = vperm.xlu0 %890, %v1035_v8  }
  0x21   : > { %265 = vperm.xlu1 %891, %v1039_v9   ;;  %260 = vperm.xlu0 %890, %v1041_v10  }
  0x25   : > { %275 = vperm.xlu1 %891, %v212_v11   ;;  %270 = vperm.xlu0 %890, %v1045_v12  }
  0x29   : > { %285 = vperm.xlu1 %891, %v214_v13   ;;  %280 = vperm.xlu0 %890, %v213_v14  }
  0x2d   : > { %295 = vperm.xlu1 %891, %v216_v15   ;;  %290 = vperm.xlu0 %890, %v215_v16  }
  0x31   : > { %893 = vset.pattern.permute.xlu1 %v971_v17  ;;  %892 = vset.pattern.permute.xlu0 %v971_v17 }
  0x32   : > { %323 = vperm.xlu1 %893, %v1023_v4   ;;  %319 = vperm.xlu0 %892, %v1017_v2  }
  0x36   : > { %327 = vperm.xlu1 %893, %v1015_v1   ;;  %331 = vperm.xlu0 %892, %v1021_v3  }
  0x3a   : > { %335 = vperm.xlu1 %893, %v1029_v6   ;;  %339 = vperm.xlu0 %892, %v1027_v5  }
  0x3e   : > { %343 = vperm.xlu1 %893, %v1035_v8   ;;  %347 = vperm.xlu0 %892, %v1033_v7  }
  0x42   : > { %351 = vperm.xlu1 %893, %v1041_v10   ;;  %355 = vperm.xlu0 %892, %v1039_v9  }
  0x46   : > { %359 = vperm.xlu1 %893, %v1045_v12   ;;  %363 = vperm.xlu0 %892, %v212_v11  }
  0x4a   : > { %367 = vperm.xlu1 %893, %v213_v14   ;;  %371 = vperm.xlu0 %892, %v214_v13  }
  0x4e   : > { %375 = vperm.xlu1 %893, %v215_v16   ;;  %379 = vperm.xlu0 %892, %v216_v15  }
  0x52   : > { %894 = vset.pattern.permute.xlu1 %v972_v18  ;;  %895 = vset.pattern.permute.xlu0 %v972_v18 }
  0x53   : > { %419 = vperm.xlu1 %894, %v1017_v2   ;;  %423 = vperm.xlu0 %895, %v1023_v4  }
  0x57   : > { %427 = vperm.xlu1 %894, %v1015_v1   ;;  %435 = vperm.xlu0 %895, %v1029_v6  }
  0x5b   : > { %431 = vperm.xlu1 %894, %v1021_v3   ;;  %443 = vperm.xlu0 %895, %v1035_v8  }
  0x5f   : > { %439 = vperm.xlu1 %894, %v1027_v5   ;;  %451 = vperm.xlu0 %895, %v1041_v10  }
  0x63   : > { %447 = vperm.xlu1 %894, %v1033_v7   ;;  %459 = vperm.xlu0 %895, %v1045_v12  }
  0x67   : > { %455 = vperm.xlu1 %894, %v1039_v9   ;;  %467 = vperm.xlu0 %895, %v213_v14  }
  0x6b   : > { %463 = vperm.xlu1 %894, %v212_v11   ;;  %475 = vperm.xlu0 %895, %v215_v16  }
  0x6f   : > { %471 = vperm.xlu1 %894, %v214_v13   ;;  %896 = vset.pattern.permute.xlu0 %v973_v19 }
  0x70   : > { %519 = vperm.xlu0 %896, %v1017_v2  }
  0x73   : > { %479 = vperm.xlu1 %894, %v216_v15  }
  0x74   : > { %531 = vperm.xlu0 %896, %v1021_v3  }
  0x77   : > { %897 = vset.pattern.permute.xlu1 %v973_v19 }
  0x78   : > { %523 = vperm.xlu1 %897, %v1023_v4   ;;  %539 = vperm.xlu0 %896, %v1027_v5  }
  0x7c   : > { %527 = vperm.xlu1 %897, %v1015_v1   ;;  %547 = vperm.xlu0 %896, %v1033_v7  }
  0x80   : > { %535 = vperm.xlu1 %897, %v1029_v6   ;;  %555 = vperm.xlu0 %896, %v1039_v9  }
  0x84   : > { %543 = vperm.xlu1 %897, %v1035_v8   ;;  %563 = vperm.xlu0 %896, %v212_v11  }
  0x88   : > { %551 = vperm.xlu1 %897, %v1041_v10   ;;  %571 = vperm.xlu0 %896, %v214_v13  }
  0x8c   : > { %559 = vperm.xlu1 %897, %v1045_v12   ;;  %579 = vperm.xlu0 %896, %v216_v15  }
  0x90   : > { %v231_v20 = vpop.permute.xlu1 %230  ;;  %567 = vperm.xlu1 %897, %v213_v14   ;;  %v1081_v21 = vpop.permute.xlu0 %220 }
  0x91   : > { %v304_v50 = vmul.f32 %v1110_v42, %v231_v20 }
  0x94   : > { %v1083_v22 = vpop.permute.xlu1 %235  ;;  %575 = vperm.xlu1 %897, %v215_v16   ;;  %v226_v23 = vpop.permute.xlu0 %225 }
  0x95   : > { %v303_v45 = vmul.f32 %v1110_v42, %v226_v23 }
  0x98   : > { %v1085_v24 = vpop.permute.xlu1 %245  ;;  %v241_v25 = vpop.permute.xlu0 %240 }
  0x99   : > { %v306_v55 = vmul.f32 %v1110_v42, %v241_v25 }
  0x9c   : > { %v1087_v26 = vpop.permute.xlu1 %255  ;;  %v251_v27 = vpop.permute.xlu0 %250 }
  0x9d   : > { %v308_v60 = vmul.f32 %v1110_v42, %v251_v27 }
  0xa0   : > { %v1089_v28 = vpop.permute.xlu1 %265  ;;  %v261_v29 = vpop.permute.xlu0 %260 }
  0xa1   : > { %v310_v1 = vmul.f32 %v1110_v42, %v261_v29 }
  0xa4   : > { %v1091_v31 = vpop.permute.xlu1 %275  ;;  %v271_v32 = vpop.permute.xlu0 %270 }
  0xa5   : > { %v312_v6 = vmul.f32 %v1110_v42, %v271_v32 }
  0xa8   : > { %v1095_v34 = vpop.permute.xlu1 %285  ;;  %v281_v35 = vpop.permute.xlu0 %280 }
  0xa9   : > { %v314_v11 = vmul.f32 %v1110_v42, %v281_v35 }
  0xac   : > { %v1099_v38 = vpop.permute.xlu1 %295  ;;  %v291_v39 = vpop.permute.xlu0 %290 }
  0xad   : > { %v316_v16 = vmul.f32 %v1110_v42, %v291_v39 }
  0xb1   : > { %v324_v43 = vpop.permute.xlu1 %323  ;;  %v320_v44 = vpop.permute.xlu0 %319 }
  0xb2   : > { %v387_v46 = vmul.f32 %v1107_v41, %v324_v43 }
  0xb4   : > { %v1114_v47 = vadd.f32 %v387_v46, %v303_v45  ;;  %v1160_v45 = vrot.slane %v1104_v40, %v484_v37  ;;  %v584_v46 = vsub.s32 3, %v1093_v33 }
  0xb5   : > { %v328_v48 = vpop.permute.xlu1 %327  ;;  %v332_v49 = vpop.permute.xlu0 %331 }
  0xb6   : > { %v388_v51 = vmul.f32 %v1107_v41, %v328_v48  ;;  %v386_v48 = vmul.f32 %v1107_v41, %v320_v44  ;;  %v305_v44 = vmul.f32 %v1110_v42, %v1083_v22  ;;  %v311_v22 = vmul.f32 %v1110_v42, %v1089_v28 }
  0xb8   : > { %v1118_v52 = vadd.f32 %v388_v51, %v304_v50 }
  0xb9   : > { %v336_v53 = vpop.permute.xlu1 %335  ;;  %v340_v54 = vpop.permute.xlu0 %339 }
  0xba   : > { %v390_v56 = vmul.f32 %v1107_v41, %v336_v53  ;;  %v302_v53 = vmul.f32 %v1110_v42, %v1081_v21  ;;  %v307_v21 = vmul.f32 %v1110_v42, %v1085_v24  ;;  %v313_v24 = vmul.f32 %v1110_v42, %v1091_v31 }
  0xbc   : > { %v1122_v57 = vadd.f32 %v390_v56, %v306_v55  ;;  %v1172_v56 = vrot.slane %v1104_v40, %v584_v46  ;;  %v309_v40 = vmul.f32 %v1110_v42, %v1087_v26 }
  0xbd   : > { %v344_v58 = vpop.permute.xlu1 %343  ;;  %v348_v59 = vpop.permute.xlu0 %347 }
  0xbe   : > { %v392_v61 = vmul.f32 %v1107_v41, %v344_v58  ;;  %v402_v58 = vadd.f32 %v386_v48, %v302_v53 }
  0xc0   : > { %v1126_v62 = vadd.f32 %v392_v61, %v308_v60  ;;  %v389_v60 = vmul.f32 %v1107_v41, %v332_v49  ;;  %v1189_v49 = vld [vmem:[%s1398_s2] ss:$0 sm:$0xff] }
  0xc1   : > { %v352_v63 = vpop.permute.xlu1 %351  ;;  %v356_v0 = vpop.permute.xlu0 %355 }
  0xc2   : > { %v394_v2 = vmul.f32 %v1107_v41, %v352_v63  ;;  %v395_v26 = vmul.f32 %v1107_v41, %v356_v0 }
  0xc4   : > { %v1130_v3 = vadd.f32 %v394_v2, %v310_v1  ;;  %v411_v48 = vadd.f32 %v395_v26, %v311_v22 }
  0xc5   : > { %v360_v4 = vpop.permute.xlu1 %359  ;;  %v1132_v5 = vpop.permute.xlu0 %363 }
  0xc6   : > { %v396_v7 = vmul.f32 %v1107_v41, %v360_v4  ;;  %v391_v4 = vmul.f32 %v1107_v41, %v340_v54  ;;  %v397_v0 = vmul.f32 %v1107_v41, %v1132_v5 }
  0xc8   : > { %v1136_v8 = vadd.f32 %v396_v7, %v312_v6  ;;  %v405_v6 = vadd.f32 %v389_v60, %v305_v44  ;;  %v393_v7 = vmul.f32 %v1107_v41, %v348_v59  ;;  %v315_v59 = vmul.f32 %v1110_v42, %v1095_v34 }
  0xc9   : > { %v368_v9 = vpop.permute.xlu1 %367  ;;  %v372_v10 = vpop.permute.xlu0 %371 }
  0xca   : > { %v398_v12 = vmul.f32 %v1107_v41, %v368_v9  ;;  %v409_v37 = vadd.f32 %v393_v7, %v309_v40 }
  0xcc   : > { %v1140_v13 = vadd.f32 %v398_v12, %v314_v11 }
  0xcd   : > { %v376_v14 = vpop.permute.xlu1 %375  ;;  %v380_v15 = vpop.permute.xlu0 %379 }
  0xce   : > { %v400_v17 = vmul.f32 %v1107_v41, %v376_v14  ;;  %v1204_v14 = vld [vmem:[%s1399_s3] ss:$0 sm:$0xff] }
  0xd0   : > { %v1144_v18 = vadd.f32 %v400_v17, %v316_v16 }
  0xd2   : > { %v420_v19 = vpop.permute.xlu1 %419  ;;  %v424_v20 = vpop.permute.xlu0 %423 }
  0xd3   : > { %v486_v55 = vmul.f32 %v1160_v45, %v420_v19  ;;  %v487_v54 = vmul.f32 %v1160_v45, %v424_v20  ;;  %v407_v19 = vadd.f32 %v391_v4, %v307_v21  ;;  %v399_v20 = vmul.f32 %v1107_v41, %v372_v10 }
  0xd5   : > { %v502_v63 = vadd.f32 %v486_v55, %v402_v58  ;;  %v503_v53 = vadd.f32 %v487_v54, %v1114_v47 }
  0xd6   : > { %v428_v23 = vpop.permute.xlu1 %427  ;;  %v1146_v25 = vpop.permute.xlu0 %435 }
  0xd7   : > { %v488_v55 = vmul.f32 %v1160_v45, %v428_v23  ;;  %v490_v21 = vmul.f32 %v1160_v45, %v1146_v25 }
  0xda   : > { %v432_v27 = vpop.permute.xlu1 %431  ;;  %v1148_v29 = vpop.permute.xlu0 %443 }
  0xdb   : > { %v489_v1 = vmul.f32 %v1160_v45, %v432_v27  ;;  %v401_v27 = vmul.f32 %v1107_v41, %v380_v15  ;;  %v492_v40 = vmul.f32 %v1160_v45, %v1148_v29 }
  0xdd   : > { %v505_v16 = vadd.f32 %v489_v1, %v405_v6 }
  0xde   : > { %v440_v30 = vpop.permute.xlu1 %439  ;;  %v1150_v32 = vpop.permute.xlu0 %451 }
  0xdf   : > { %v491_v12 = vmul.f32 %v1160_v45, %v440_v30  ;;  %v317_v30 = vmul.f32 %v1110_v42, %v1099_v38  ;;  %v413_v42 = vadd.f32 %v397_v0, %v313_v24  ;;  %v494_v4 = vmul.f32 %v1160_v45, %v1150_v32 }
  0xe1   : > { %v507_v58 = vadd.f32 %v491_v12, %v407_v19  ;;  %v1225_v44 = vadd.f32 %v401_v27, %v317_v30 }
  0xe2   : > { %v448_v35 = vpop.permute.xlu1 %447  ;;  %v1152_v36 = vpop.permute.xlu0 %459 }
  0xe3   : > { %v496_v27 = vmul.f32 %v1160_v45, %v1152_v36 }
  0xe6   : > { %v1155_v39 = vpop.permute.xlu1 %455  ;;  %v1157_v43 = vpop.permute.xlu0 %467 }
  0xe7   : > { %v495_v25 = vmul.f32 %v1160_v45, %v1155_v39 }
  0xe9   : > { %v511_v30 = vadd.f32 %v495_v25, %v411_v48  ;;  %v498_v25 = vmul.f32 %v1160_v45, %v1157_v43 }
  0xea   : > { %v1164_v50 = vpop.permute.xlu1 %463  ;;  %v1166_v51 = vpop.permute.xlu0 %475 }
  0xeb   : > { %v497_v29 = vmul.f32 %v1160_v45, %v1164_v50 }
  0xee   : > { %v1175_v61 = vpop.permute.xlu1 %471 }
  0xef   : > { %v520_v33 = vpop.permute.xlu0 %519 }
  0xf0   : > { %v586_v2 = vmul.f32 %v1172_v56, %v520_v33  ;;  %v415_v33 = vadd.f32 %v399_v20, %v315_v59  ;;  %v508_v59 = vadd.f32 %v492_v40, %v1126_v62 }
  0xf2   : > { %v602_v9 = vadd.f32 %v586_v2, %v502_v63  ;;  %v1194_v11 = vpop.permute.xlu1 %479  ;;  %v493_v63 = vmul.f32 %v1160_v45, %v448_v35  ;;  %v504_v2 = vadd.f32 %v488_v55, %v1118_v52 }
  0xf3   : > { %v532_v28 = vpop.permute.xlu0 %531  ;;  %v501_v40 = vmul.f32 %v1160_v45, %v1194_v11 }
  0xf4   : > { %v625_v17 = vmul.f32 %v1189_v49, %v602_v9  ;;  %v589_v31 = vmul.f32 %v1172_v56, %v532_v28  ;;  %v509_v52 = vadd.f32 %v493_v63, %v409_v37  ;;  %v506_v28 = vadd.f32 %v490_v21, %v1122_v57 }
  0xf6   : > { %v1217_v46 = vadd.f32 %v1204_v14, %v625_v17  ;;  %v605_v34 = vadd.f32 %v589_v31, %v505_v16  ;;  %v510_v16 = vadd.f32 %v494_v4, %v1130_v3  ;;  %v513_v3 = vadd.f32 %v497_v29, %v413_v42 }
  0xf7   : > { %v524_v60 = vpop.permute.xlu1 %523  ;;  %v540_v5 = vpop.permute.xlu0 %539 }
  0xf8   : > { %v860_v10 = vmul.f32 -1.442695, %v1217_v46  ;;  %v628_v41 = vmul.f32 %v1189_v49, %v605_v34  ;;  %v587_v15 = vmul.f32 %v1172_v56, %v524_v60  ;;  %v591_v38 = vmul.f32 %v1172_v56, %v540_v5 }
  0xfa   : > { %898 = vpow2.f32 %v860_v10  ;;  %v1229_v47 = vadd.f32 %v1204_v14, %v628_v41  ;;  %v603_v23 = vadd.f32 %v587_v15, %v503_v53  ;;  %v607_v1 = vadd.f32 %v591_v38, %v507_v58 }
  0xfb   : > { %v528_v22 = vpop.permute.xlu1 %527  ;;  %v548_v6 = vpop.permute.xlu0 %547  ;;  %v499_v53 = vmul.f32 %v1160_v45, %v1175_v61  ;;  %v512_v38 = vadd.f32 %v496_v27, %v1136_v8 }
  0xfc   : > { %v863_v35 = vmul.f32 -1.442695, %v1229_v47  ;;  %v626_v7 = vmul.f32 %v1189_v49, %v603_v23  ;;  %v630_v9 = vmul.f32 %v1189_v49, %v607_v1  ;;  %v588_v24 = vmul.f32 %v1172_v56, %v528_v22 }
  0xfd   : > { %v593_v26 = vmul.f32 %v1172_v56, %v548_v6  ;;  %v515_v21 = vadd.f32 %v499_v53, %v415_v33 }
  0xfe   : > { %900 = vpow2.f32 %v863_v35  ;;  %v1248_v32 = vadd.f32 %v1204_v14, %v626_v7  ;;  %v1251_v54 = vadd.f32 %v1204_v14, %v630_v9  ;;  %v604_v12 = vadd.f32 %v588_v24, %v504_v2 }
  0xff   : > { %v609_v39 = vadd.f32 %v593_v26, %v509_v52  ;;  %v536_v17 = vpop.permute.xlu1 %535  ;;  %v556_v31 = vpop.permute.xlu0 %555 }
 0x100   : > { %v861_v50 = vmul.f32 -1.442695, %v1248_v32  ;;  %v865_v19 = vmul.f32 -1.442695, %v1251_v54  ;;  %v627_v0 = vmul.f32 %v1189_v49, %v604_v12  ;;  %v590_v20 = vmul.f32 %v1172_v56, %v536_v17 }
 0x101   : > { %v632_v57 = vmul.f32 %v1189_v49, %v609_v39  ;;  %v595_v62 = vmul.f32 %v1172_v56, %v556_v31  ;;  %v517_v12 = vadd.f32 %v501_v40, %v1225_v44 }
 0x102   : > { %902 = vpow2.f32 %v861_v50  ;;  %v1265_v37 = vadd.f32 %v1204_v14, %v627_v0  ;;  %v606_v34 = vadd.f32 %v590_v20, %v506_v28 }
 0x103   : > { %904 = vpow2.f32 %v865_v19  ;;  %v1270_v55 = vadd.f32 %v1204_v14, %v632_v57  ;;  %v611_v58 = vadd.f32 %v595_v62, %v511_v30  ;;  %v544_v36 = vpop.permute.xlu1 %543  ;;  %v564_v48 = vpop.permute.xlu0 %563 }
 0x104   : > { %v899_v60 = vpop.eup %898  ;;  %v862_v5 = vmul.f32 -1.442695, %v1265_v37  ;;  %v629_v10 = vmul.f32 %v1189_v49, %v606_v34  ;;  %v592_v41 = vmul.f32 %v1172_v56, %v544_v36  ;;  %v597_v15 = vmul.f32 %v1172_v56, %v564_v48 }
 0x105   : > { %v712_v42 = vadd.f32 1.0, %v899_v60  ;;  %v867_v61 = vmul.f32 -1.442695, %v1270_v55  ;;  %v634_v63 = vmul.f32 %v1189_v49, %v611_v58  ;;  %v500_v48 = vmul.f32 %v1160_v45, %v1166_v51 }
 0x106   : > { %906 = vpow2.f32 %v862_v5  ;;  %v1280_v23 = vadd.f32 %v1204_v14, %v629_v10  ;;  %v608_v1 = vadd.f32 %v592_v41, %v508_v59  ;;  %v613_v2 = vadd.f32 %v597_v15, %v513_v3 }
 0x107   : > { %908 = vrcp.f32 %v712_v42  ;;  %v1285_v4 = vadd.f32 %v1204_v14, %v634_v63  ;;  %v552_v8 = vpop.permute.xlu1 %551  ;;  %v572_v22 = vpop.permute.xlu0 %571 }
 0x108   : > { %v901_v6 = vpop.eup %900  ;;  %910 = vpow2.f32 %v867_v61  ;;  %v864_v35 = vmul.f32 -1.442695, %v1280_v23  ;;  %v631_v7 = vmul.f32 %v1189_v49, %v608_v1  ;;  %v636_v9 = vmul.f32 %v1189_v49, %v613_v2 }
 0x109   : > { %v715_v24 = vadd.f32 1.0, %v901_v6  ;;  %v869_v33 = vmul.f32 -1.442695, %v1285_v4  ;;  %v594_v52 = vmul.f32 %v1172_v56, %v552_v8  ;;  %v599_v11 = vmul.f32 %v1172_v56, %v572_v22 }
 0x10a   : > { %912 = vpow2.f32 %v864_v35  ;;  %v1296_v29 = vadd.f32 %v1204_v14, %v631_v7  ;;  %v1299_v26 = vadd.f32 %v1204_v14, %v636_v9  ;;  %v516_v22 = vadd.f32 %v500_v48, %v1144_v18 }
 0x10b   : > { %914 = vrcp.f32 %v715_v24  ;;  %v610_v28 = vadd.f32 %v594_v52, %v510_v16  ;;  %v615_v59 = vadd.f32 %v599_v11, %v515_v21  ;;  %v560_v39 = vpop.permute.xlu1 %559  ;;  %v580_v17 = vpop.permute.xlu0 %579  ;;  %v514_v16 = vadd.f32 %v498_v25, %v1140_v13 }
 0x10c   : > { %v903_v31 = vpop.eup %902  ;;  %916 = vpow2.f32 %v869_v33  ;;  %v866_v50 = vmul.f32 -1.442695, %v1296_v29  ;;  %v871_v43 = vmul.f32 -1.442695, %v1299_v26  ;;  %v596_v19 = vmul.f32 %v1172_v56, %v560_v39 }
 0x10d   : > { %v905_v0 = vpop.eup %904  ;;  %v713_v20 = vadd.f32 1.0, %v903_v31  ;;  %v633_v27 = vmul.f32 %v1189_v49, %v610_v28  ;;  %v638_v30 = vmul.f32 %v1189_v49, %v615_v59  ;;  %v601_v44 = vmul.f32 %v1172_v56, %v580_v17 }
 0x10e   : > { %v717_v57 = vadd.f32 1.0, %v905_v0  ;;  %918 = vpow2.f32 %v866_v50  ;;  %v612_v62 = vadd.f32 %v596_v19, %v512_v38 }
 0x10f   : > { %920 = vrcp.f32 %v713_v20  ;;  %v1310_v3 = vadd.f32 %v1204_v14, %v633_v27  ;;  %v1313_v34 = vadd.f32 %v1204_v14, %v638_v30  ;;  %v617_v53 = vadd.f32 %v601_v44, %v517_v12  ;;  %v568_v58 = vpop.permute.xlu1 %567 }
 0x110   : > { %v907_v36 = vpop.eup %906  ;;  %922 = vrcp.f32 %v717_v57  ;;  %v635_v60 = vmul.f32 %v1189_v49, %v612_v62  ;;  %v598_v13 = vmul.f32 %v1172_v56, %v568_v58 }
 0x111   : > { %v909_v5 = vpop.eup %908  ;;  %v714_v10 = vadd.f32 1.0, %v907_v36  ;;  %924 = vpow2.f32 %v871_v43  ;;  %v868_v41 = vmul.f32 -1.442695, %v1310_v3  ;;  %v873_v15 = vmul.f32 -1.442695, %v1313_v34 }
 0x112   : > { %v911_v45 = vpop.eup %910  ;;  %v760_v51 = vmul.f32 %v909_v5, %v1217_v46  ;;  %v1330_v38 = vadd.f32 %v1204_v14, %v635_v60  ;;  %v640_v42 = vmul.f32 %v1189_v49, %v617_v53  ;;  %v614_v61 = vadd.f32 %v598_v13, %v514_v16 }
 0x113   : > { %926 = vrcp.f32 %v714_v10  ;;  %v719_v63 = vadd.f32 1.0, %v911_v45  ;;  %v576_v1 = vpop.permute.xlu1 %575 }
 0x114   : > { %v913_v2 = vpop.eup %912  ;;  %777 = vst.msk [vmem:[%s1324_s30] sm:$0xff] %vm776_vm0, %v760_v51  ;;  %928 = vpow2.f32 %v868_v41  ;;  %v870_v21 = vmul.f32 -1.442695, %v1330_v38  ;;  %v1337_v40 = vadd.f32 %v1204_v14, %v640_v42  ;;  %v637_v46 = vmul.f32 %v1189_v49, %v614_v61 }
 0x115   : > { %v915_v8 = vpop.eup %914  ;;  %930 = vrcp.f32 %v719_v63  ;;  %v716_v6 = vadd.f32 1.0, %v913_v2  ;;  %v600_v35 = vmul.f32 %v1172_v56, %v576_v1 }
 0x116   : > { %v917_v7 = vpop.eup %916  ;;  %v763_v9 = vmul.f32 %v915_v8, %v1229_v47  ;;  %932 = vpow2.f32 %v873_v15  ;;  %v875_v24 = vmul.f32 -1.442695, %v1337_v40  ;;  %v1345_v33 = vadd.f32 %v1204_v14, %v637_v46 }
 0x117   : > { %934 = vrcp.f32 %v716_v6  ;;  %v721_v52 = vadd.f32 1.0, %v917_v7  ;;  %v616_v11 = vadd.f32 %v600_v35, %v516_v22 }
 0x118   : > { %v919_v25 = vpop.eup %918  ;;  %780 = vst.msk [vmem:[%s1324_s30 + $0x18] sm:$0xff] %vm776_vm0, %v763_v9  ;;  %936 = vpow2.f32 %v870_v21  ;;  %v872_v18 = vmul.f32 -1.442695, %v1345_v33 }
 0x119   : > { %v921_v56 = vpop.eup %920  ;;  %938 = vrcp.f32 %v721_v52  ;;  %v718_v47 = vadd.f32 1.0, %v919_v25  ;;  %v639_v12 = vmul.f32 %v1189_v49, %v616_v11 }
 0x11a   : > { %v923_v28 = vpop.eup %922  ;;  %v761_v59 = vmul.f32 %v921_v56, %v1248_v32  ;;  %940 = vpow2.f32 %v875_v24 }
 0x11b   : > { %v925_v39 = vpop.eup %924  ;;  %v765_v17 = vmul.f32 %v923_v28, %v1251_v54  ;;  %942 = vrcp.f32 %v718_v47  ;;  %v662_v31 = vadd.f32 %v1204_v14, %v639_v12 }
 0x11c   : > { %778 = vst.msk [vmem:[%s1324_s30 + $0x8] sm:$0xff] %vm776_vm0, %v761_v59  ;;  %v723_v50 = vadd.f32 1.0, %v925_v39  ;;  %944 = vpow2.f32 %v872_v18 }
 0x11d   : > { %v927_v43 = vpop.eup %926  ;;  %782 = vst.msk [vmem:[%s1324_s30 + $0x28] sm:$0xff] %vm776_vm0, %v765_v17  ;;  %v874_v49 = vmul.f32 -1.442695, %v662_v31 }
 0x11e   : > { %v929_v19 = vpop.eup %928  ;;  %v762_v32 = vmul.f32 %v927_v43, %v1265_v37  ;;  %946 = vrcp.f32 %v723_v50 }
 0x11f   : > { %v931_v0 = vpop.eup %930  ;;  %v720_v54 = vadd.f32 1.0, %v929_v19  ;;  %948 = vpow2.f32 %v874_v49 }
 0x120   : > { %v933_v20 = vpop.eup %932  ;;  %779 = vst.msk [vmem:[%s1324_s30 + $0x10] sm:$0xff] %vm776_vm0, %v762_v32  ;;  %v767_v14 = vmul.f32 %v931_v0, %v1270_v55 }
 0x121   : > { %v935_v27 = vpop.eup %934  ;;  %950 = vrcp.f32 %v720_v54  ;;  %v725_v30 = vadd.f32 1.0, %v933_v20 }
 0x122   : > { %v937_v44 = vpop.eup %936  ;;  %784 = vst.msk [vmem:[%s1324_s30 + $0x38] sm:$0xff] %vm776_vm0, %v767_v14  ;;  %v764_v16 = vmul.f32 %v935_v27, %v1280_v23 }
 0x123   : > { %v939_v37 = vpop.eup %938  ;;  %952 = vrcp.f32 %v725_v30  ;;  %v722_v57 = vadd.f32 1.0, %v937_v44 }
 0x124   : > { %v941_v62 = vpop.eup %940  ;;  %781 = vst.msk [vmem:[%s1324_s30 + $0x20] sm:$0xff] %vm776_vm0, %v764_v16  ;;  %v769_v53 = vmul.f32 %v939_v37, %v1285_v4 }
 0x125   : > { %v943_v55 = vpop.eup %942  ;;  %954 = vrcp.f32 %v722_v57  ;;  %v727_v58 = vadd.f32 1.0, %v941_v62 }
 0x126   : > { %v945_v36 = vpop.eup %944  ;;  %786 = vst.msk [vmem:[%s1324_s30 + $0x48] sm:$0xff] %vm776_vm0, %v769_v53  ;;  %v766_v48 = vmul.f32 %v943_v55, %v1296_v29 }
 0x127   : > { %956 = vrcp.f32 %v727_v58  ;;  %v724_v23 = vadd.f32 1.0, %v945_v36 }
 0x128   : > { %v947_v60 = vpop.eup %946  ;;  %783 = vst.msk [vmem:[%s1324_s30 + $0x30] sm:$0xff] %vm776_vm0, %v766_v48 }
 0x129   : > { %v949_v13 = vpop.eup %948  ;;  %v771_v4 = vmul.f32 %v947_v60, %v1299_v26  ;;  %958 = vrcp.f32 %v724_v23 }
 0x12a   : > { %v726_v5 = vadd.f32 1.0, %v949_v13 }
 0x12b   : > { %v951_v10 = vpop.eup %950  ;;  %788 = vst.msk [vmem:[%s1324_s30 + $0x58] sm:$0xff] %vm776_vm0, %v771_v4 }
 0x12c   : > { %v768_v41 = vmul.f32 %v951_v10, %v1310_v3  ;;  %960 = vrcp.f32 %v726_v5 }
 0x12d   : > { %v953_v29 = vpop.eup %952 }
 0x12e   : > { %785 = vst.msk [vmem:[%s1324_s30 + $0x40] sm:$0xff] %vm776_vm0, %v768_v41  ;;  %v773_v15 = vmul.f32 %v953_v29, %v1313_v34 }
 0x12f   : > { %v955_v45 = vpop.eup %954 }
 0x130   : > { %790 = vst.msk [vmem:[%s1324_s30 + $0x68] sm:$0xff] %vm776_vm0, %v773_v15  ;;  %v770_v26 = vmul.f32 %v955_v45, %v1330_v38 }
 0x131   : > { %v957_v51 = vpop.eup %956 }
 0x132   : > { %787 = vst.msk [vmem:[%s1324_s30 + $0x50] sm:$0xff] %vm776_vm0, %v770_v26  ;;  %v775_v42 = vmul.f32 %v957_v51, %v1337_v40 }
 0x133   : > { %v959_v61 = vpop.eup %958 }
 0x134   : > { %792 = vst.msk [vmem:[%s1324_s30 + $0x78] sm:$0xff] %vm776_vm0, %v775_v42  ;;  %v772_v3 = vmul.f32 %v959_v61, %v1345_v33 }
 0x136   : > { %v961_v63 = vpop.eup %960  ;;  %789 = vst.msk [vmem:[%s1324_s30 + $0x60] sm:$0xff] %vm776_vm0, %v772_v3 }
 0x137   : > { %v774_v1 = vmul.f32 %v961_v63, %v662_v31 }
 0x139   : > { %791 = vst.msk [vmem:[%s1324_s30 + $0x70] sm:$0xff] %vm776_vm0, %v774_v1 }
 0x13a PF: > { %s14_s15 = sadd.s32 1, %s968_s15  }
 0x13b   : > { %p11_p4 = scmp.ge.s32.totalorder %s14_s15, 6  }
 0x13d   :  { %13 = sbr.rel (!%p11_p4) target bundleno = 1 (0x1), region = 66 }

</bundles_post_ra>
